<compile_context>
chip_gen: v7x
topology: tpu7x:2x2x1
jax: 0.10.0
libtpu: 0.0.40
codegen_flags: <defaults>
</compile_context>

<pallas_src>
import functools

import jax
import jax.numpy as jnp
from jax import lax
from jax.experimental import pallas as pl
from jax.experimental.pallas import tpu as pltpu

_NEG = -1e30  # Python float -> inlined literal inside the kernel (no capture)


def _round_up(n, m=8):
    return ((n + m - 1) // m) * m


# ----------------------------------------------------------------------------
# Fused kernel: in-kernel embedding + batched LSTM + attention + max-pools
# ----------------------------------------------------------------------------
def _build_fused_kernel(*, layout, S, batch, n_groups, q_valid, a_valid,
                        VP, E, H, FCP):
    """[question | c_answers (| n_answers)] batched along B in one program."""
    H4 = 4 * H
    A = n_groups * batch
    Bt = (1 + n_groups) * batch
    R_EMB, R_WIH, R_WHH = layout["emb"], layout["wih"], layout["whh"]
    R_WAM, R_WQM = layout["wam"], layout["wqm"]
    R_BL, R_BAM, R_BQM = layout["b_lstm"], layout["b_am"], layout["b_qm"]
    R_WMS, R_SC = layout["wms"], layout["scal"]

    def kernel(tok_ref, gate_ref, pk_ref, out_ref, xproj_sc, seq_sc):
        # ---- embedding lookup fused with the input projection (hoisted) ----
        # tok_proj[v] = emb[v] @ W_ih  -> one-hot selection replaces the gather.
        tok_proj = jnp.dot(
            pk_ref[R_EMB:R_EMB + VP, 0:E].astype(jnp.bfloat16),
            pk_ref[R_WIH:R_WIH + E, 0:H4].astype(jnp.bfloat16),
            preferred_element_type=jnp.float32)                      # (VP, 4H)
        onehot = (lax.broadcasted_iota(jnp.int32, (S, Bt, VP), 2)
                  == tok_ref[...][:, :, None]).astype(jnp.bfloat16)  # (S, Bt, VP)
        xproj_sc[...] = lax.dot_general(
            onehot, tok_proj.astype(jnp.bfloat16), (((2,), (0,)), ((), ())),
            preferred_element_type=jnp.float32) + pk_ref[R_BL:R_BL + 1, 0:H4]

        whh = pk_ref[R_WHH:R_WHH + H, 0:H4].astype(jnp.bfloat16)     # resident bf16
        lane = lax.broadcasted_iota(jnp.int32, (Bt, H4), 1)
        g_mask = (lane >= 2 * H) & (lane < 3 * H)                    # gate order i,f,g,o

        def step(t, carry):
            h, c, qmax = carry
            gates = xproj_sc[t] + jnp.dot(h.astype(jnp.bfloat16), whh,
                                          preferred_element_type=jnp.float32)
            # whole-vreg transcendentals + one lane-mask select
            act = jnp.where(g_mask, jnp.tanh(gates), jax.nn.sigmoid(gates))
            i_g = act[:, 0:H]
            f_g = act[:, H:2 * H]
            g_g = act[:, 2 * H:3 * H]
            o_g = act[:, 3 * H:4 * H]
            c_new = f_g * c + i_g * g_g
            h_new = o_g * jnp.tanh(c_new)
            # answer rows only -> VMEM scratch (question rows never stored)
            seq_sc[t] = h_new[batch:, :]
            # question rows -> online max with pack/pad_packed semantics:
            #   h if t < lengths[b]; 0 if lengths[b] <= t < q_len; -inf past q_len
            pad0 = jnp.where(t < q_valid, 0.0, _NEG)
            cand = h_new[0:batch, :] * gate_ref[t] + pad0
            return h_new, c_new, jnp.maximum(qmax, cand)

        zeros = jnp.zeros((Bt, H), jnp.float32)
        qinit = jnp.full((batch, H), _NEG, jnp.float32)
        _, _, q_out = lax.fori_loop(0, S, step, (zeros, zeros, qinit),
                                    unroll=True)
        out_ref[0:batch, :] = q_out

        # ---- merged attention epilogue: all answer groups in one pass ----
        seq = seq_sc[...]                                            # (S, A, H)
        aux2 = jnp.dot(q_out.astype(jnp.bfloat16),
                       pk_ref[R_WQM:R_WQM + H, 0:FCP].astype(jnp.bfloat16),
                       preferred_element_type=jnp.float32) \
            + pk_ref[R_BQM:R_BQM + 1, 0:FCP]                         # (batch, FCP)
        aux2_full = jnp.concatenate([aux2] * n_groups, axis=0)       # (A, FCP)
        aux1 = lax.dot_general(seq.astype(jnp.bfloat16),
                               pk_ref[R_WAM:R_WAM + H, 0:FCP].astype(jnp.bfloat16),
                               (((2,), (0,)), ((), ())),
                               preferred_element_type=jnp.float32) \
            + pk_ref[R_BAM:R_BAM + 1, 0:FCP]                         # (S, A, FCP)
        maq = jnp.tanh(aux1 + aux2_full)
        # N=1 scoring matmul replaced by VPU multiply + lane reduction
        s = (jnp.sum(maq * pk_ref[R_WMS:R_WMS + 1, 0:FCP],
                     axis=-1, keepdims=True)
             + pk_ref[R_SC:R_SC + 1, 0:1])                           # (S, A, 1)
        saq = jnp.exp(s) * pk_ref[R_SC:R_SC + 1, 1:2]                # unstabilized exp, matches reference
        scaled = seq * saq
        t_ids = lax.broadcasted_iota(jnp.int32, (S, 1, 1), 0)
        out_ref[batch:, :] = jnp.max(
            jnp.where(t_ids < a_valid, scaled, _NEG), axis=0)

    return kernel


# ----------------------------------------------------------------------------
# Parameters (deterministic, synthetic; LSTM weights pre-transposed (in, out))
# ----------------------------------------------------------------------------
def init_params(key, vocab, emb_dim, hidden, fc_size):
    ks = jax.random.split(key, 12)
    nrm = lambda k, s: 0.1 * jax.random.normal(k, s, jnp.float32)
    H = hidden
    return {
        "emb": nrm(ks[0], (vocab, emb_dim)),
        # LSTM weights, PyTorch gate order (i, f, g, o)
        "w_ih": nrm(ks[1], (emb_dim, 4 * H)),
        "w_hh": nrm(ks[2], (H, 4 * H)),
        "b_lstm": nrm(ks[3], (1, 4 * H)) + nrm(ks[4], (1, 4 * H)),   # b_ih + b_hh
        "w_am": nrm(ks[5], (H, fc_size)),
        "b_am": nrm(ks[6], (1, fc_size)),
        "w_qm": nrm(ks[7], (H, fc_size)),
        "b_qm": nrm(ks[8], (1, fc_size)),
        "w_ms": nrm(ks[9], (fc_size, 1)),
        "b_ms": nrm(ks[10], (1, 1)),
        "w_scalar": nrm(ks[11], (1, 1)),                             # Linear(1,1,bias=False)
    }


# ----------------------------------------------------------------------------
# One-time packing of every weight/bias into one lane-dense (K, 128) f32 block
# ----------------------------------------------------------------------------
def pack_params(params):
    V, E = params["emb"].shape
    H = params["w_hh"].shape[0]
    fc = params["w_am"].shape[1]
    H4 = 4 * H
    W = max(H4, 128, E)
    assert fc <= W and E <= W and H4 <= W

    layout, blocks = {}, []
    row = 0

    def add(name, a, rows=None):
        nonlocal row
        a = jnp.asarray(a, jnp.float32)
        rows = a.shape[0] if rows is None else rows
        blk = jnp.zeros((rows, W), jnp.float32).at[:a.shape[0], :a.shape[1]].set(a)
        layout[name] = row
        blocks.append(blk)
        row += rows

    add("emb", params["emb"], _round_up(V))       # zero-padded rows are harmless
    add("wih", params["w_ih"], _round_up(E))
    add("whh", params["w_hh"], _round_up(H))
    add("wam", params["w_am"], _round_up(H))      # fc cols zero-padded to W lanes
    add("wqm", params["w_qm"], _round_up(H))
    add("b_lstm", params["b_lstm"])
    add("b_am", params["b_am"])
    add("b_qm", params["b_qm"])
    add("wms", params["w_ms"].T)                  # (1, fc) zero-padded to W lanes
    add("scal", jnp.concatenate([params["b_ms"].reshape(1, 1),
                                 params["w_scalar"].reshape(1, 1)], axis=1))
    if row % 8:
        blocks.append(jnp.zeros((_round_up(row) - row, W), jnp.float32))
        row = _round_up(row)
    pk = jnp.concatenate(blocks, axis=0)          # (K, W) single weight DMA
    meta = dict(layout=layout, V=V, VP=_round_up(V), E=E, H=H, fc=fc, FCP=W, K=row)
    return pk, meta


# ----------------------------------------------------------------------------
# Forward pass: everything post-tokenization in one Pallas program
# ----------------------------------------------------------------------------
def forward(pk, question, c_answers, n_answers, lengths, *, meta, isvalid=False):
    q_len, batch = question.shape
    a_len = c_answers.shape[0]
    n_groups = 1 if isvalid else 2
    S = max(q_len, a_len)
    H, E, VP, FCP = meta["H"], meta["E"], meta["VP"], meta["FCP"]
    H4 = 4 * H
    Bt = (1 + n_groups) * batch
    A = n_groups * batch

    def pad_time(tok):
        return jnp.pad(tok, ((0, S - tok.shape[0]), (0, 0)))

    groups = [question, c_answers] + ([] if isvalid else [n_answers])
    tokens = jnp.concatenate([pad_time(t) for t in groups], axis=1).astype(jnp.int32)

    # pack/pad_packed gate for the question rows: 1.0 iff t < lengths[b]
    lens = jnp.reshape(lengths, (-1,)).astype(jnp.int32)
    q_gate = (jnp.arange(S, dtype=jnp.int32)[:, None] < lens[None, :]
              ).astype(jnp.float32)[:, :, None]                      # (S, batch, 1)

    kernel = _build_fused_kernel(layout=meta["layout"], S=S, batch=batch,
                                 n_groups=n_groups, q_valid=q_len, a_valid=a_len,
                                 VP=VP, E=E, H=H, FCP=FCP)

    flops = 2 * (VP * E * H4 + S * Bt * VP * H4 + S * Bt * H * H4
                 + batch * H * FCP + S * A * H * FCP) + 2 * S * A * FCP
    transcendentals = S * Bt * (2 * H4 + H) + S * A * (FCP + 1)
    bytes_accessed = 4 * (pk.size + tokens.size + q_gate.size + Bt * H)

    out = pl.pallas_call(
        kernel,
        out_shape=jax.ShapeDtypeStruct((Bt, H), jnp.float32),
        scratch_shapes=[pltpu.VMEM((S, Bt, H4), jnp.float32),   # hoisted x@W_ih
                        pltpu.VMEM((S, A, H), jnp.float32)],    # answer LSTM outputs
        cost_estimate=pl.CostEstimate(flops=int(flops),
                                      transcendentals=int(transcendentals),
                                      bytes_accessed=int(bytes_accessed)),
    )(tokens, q_gate, pk)

    q_out = out[0:batch]
    if isvalid:
        return q_out, out[batch:]
    return q_out, out[batch:2 * batch], out[2 * batch:]


# ----------------------------------------------------------------------------
# Pure-JAX reference (mirrors the PyTorch module) for a correctness check
# ----------------------------------------------------------------------------
def reference_forward(params, question, c_answers, n_answers, lengths, isvalid=False):
    H = params["w_hh"].shape[0]
    emb_tab = params["emb"]

    def run_lstm(tokens):
        x = emb_tab[tokens]                                           # (S, B, E)
        B = x.shape[1]

        def step(carry, xt):
            h, c = carry
            gates = xt @ params["w_ih"] + h @ params["w_hh"] + params["b_lstm"]
            i = jax.nn.sigmoid(gates[:, 0 * H:1 * H])
            f = jax.nn.sigmoid(gates[:, 1 * H:2 * H])
            g = jnp.tanh(gates[:, 2 * H:3 * H])
            o = jax.nn.sigmoid(gates[:, 3 * H:4 * H])
            c = f * c + i * g
            h = o * jnp.tanh(c)
            return (h, c), h

        init = (jnp.zeros((B, H), jnp.float32), jnp.zeros((B, H), jnp.float32))
        _, hs = lax.scan(step, init, x)
        return hs                                                     # (S, B, H)

    q_hs = run_lstm(question)
    S = q_hs.shape[0]
    mask = (jnp.arange(S)[:, None] < lengths[None, :]).astype(q_hs.dtype)
    q_out = jnp.max(q_hs * mask[:, :, None], axis=0)                  # (B, H)
    aux2 = q_out @ params["w_qm"] + params["b_qm"]

    def answer_branch(tokens):
        a_bt = jnp.transpose(run_lstm(tokens), (1, 0, 2))             # (B, L, H)
        aux1 = a_bt @ params["w_am"] + params["b_am"]
        maq = jnp.tanh(aux1 + aux2[:, None, :])
        saq = jnp.exp(maq @ params["w_ms"] + params["b_ms"]) * params["w_scalar"][0, 0]
        return jnp.max(a_bt * saq, axis=1)

    a_out = answer_branch(c_answers)
    if isvalid:
        return q_out, a_out
    return q_out, a_out, answer_branch(n_answers)


# ----------------------------------------------------------------------------
if __name__ == "__main__":
    vocab_size = 50
    embedding_dim = 16
    hidden_size = 32
    n_layers = 1            # single layer, unidirectional -> dropout inactive
    fc_size = 24
    batch = 2
    q_len = 8
    a_len = 6

    key = jax.random.PRNGKey(0)
    kp, kq, ka, kn = jax.random.split(key, 4)
    params = init_params(kp, vocab_size, embedding_dim, hidden_size, fc_size)
    pk, meta = pack_params(params)    # one-time host-side packing (outside jit)

    question = jax.random.randint(kq, (q_len, batch), 0, vocab_size, jnp.int32)
    c_answers = jax.random.randint(ka, (a_len, batch), 0, vocab_size, jnp.int32)
    n_answers = jax.random.randint(kn, (a_len, batch), 0, vocab_size, jnp.int32)
    lengths = jnp.array([q_len, q_len - 3], dtype=jnp.int32)  # sorted, as pack() requires

    fwd = jax.jit(functools.partial(forward, meta=meta, isvalid=False))
    q_out, a_out, n_out = fwd(pk, question, c_answers, n_answers, lengths)
    jax.block_until_ready((q_out, a_out, n_out))

    assert q_out.shape == (batch, hidden_size)
    assert a_out.shape == (batch, hidden_size)
    assert n_out.shape == (batch, hidden_size)

    q_ref, a_ref, n_ref = reference_forward(params, question, c_answers, n_answers,
                                            lengths, isvalid=False)
    ok = (jnp.allclose(q_out, q_ref, atol=3e-2, rtol=3e-2)
          and jnp.allclose(a_out, a_ref, atol=3e-2, rtol=3e-2)
          and jnp.allclose(n_out, n_ref, atol=3e-2, rtol=3e-2))
    assert bool(ok), "Pallas forward does not match the JAX reference"

    print("KERNEL_OK")
</pallas_src>

<mosaic_0001>
module attributes {stable_mosaic.version = 11 : i64} {
  func.func @kernel(%arg0: memref<8x6xi32, #tpu.memory_space<vmem>>, %arg1: memref<8x2x1xf32, #tpu.memory_space<vmem>>, %arg2: memref<176x128xf32, #tpu.memory_space<vmem>>, %arg3: memref<6x32xf32, #tpu.memory_space<vmem>>, %arg4: memref<8x6x128xf32, #tpu.memory_space<vmem>>, %arg5: memref<8x4x32xf32, #tpu.memory_space<vmem>>) attributes {dimension_semantics = [], scalar_prefetch = 0 : i64, scratch_operands = 2 : i64, tpu.core_type = #tpu.core_type<tc>} {
    %c0 = arith.constant 0 : index
    %c0_0 = arith.constant 0 : index
    %0 = vector.load %arg2[%c0, %c0_0] : memref<176x128xf32, #tpu.memory_space<vmem>>, vector<56x16xf32>
    %1 = arith.truncf %0 : vector<56x16xf32> to vector<56x16xbf16>
    %c56 = arith.constant 56 : index
    %c0_1 = arith.constant 0 : index
    %2 = vector.load %arg2[%c56, %c0_1] : memref<176x128xf32, #tpu.memory_space<vmem>>, vector<16x128xf32>
    %3 = arith.truncf %2 : vector<16x128xf32> to vector<16x128xbf16>
    %cst = arith.constant dense<0.000000e+00> : vector<56x128xf32>
    %4 = tpu.matmul %1, %3, %cst {dimension_numbers = #tpu.dot_dimension_numbers<[1], [0], [0], [1], [0, 0, 1, 1], [], []>} : vector<56x16xbf16>, vector<16x128xbf16>, vector<56x128xf32> -> vector<56x128xf32>
    %5 = tpu.iota {dimensions = array<i32: 2>} : vector<8x6x56xi32>
    %c0_2 = arith.constant 0 : index
    %c0_3 = arith.constant 0 : index
    %6 = vector.load %arg0[%c0_2, %c0_3] : memref<8x6xi32, #tpu.memory_space<vmem>>, vector<8x6xi32>
    %7 = vector.shape_cast %6 : vector<8x6xi32> to vector<8x6x1xi32>
    %8 = vector.broadcast %7 : vector<8x6x1xi32> to vector<8x6x56xi32>
    %9 = arith.cmpi eq, %5, %8 : vector<8x6x56xi32>
    %10 = arith.extui %9 : vector<8x6x56xi1> to vector<8x6x56xi32>
    %11 = arith.sitofp %10 : vector<8x6x56xi32> to vector<8x6x56xf32>
    %12 = arith.truncf %11 : vector<8x6x56xf32> to vector<8x6x56xbf16>
    %13 = arith.truncf %4 : vector<56x128xf32> to vector<56x128xbf16>
    %cst_4 = arith.constant dense<0.000000e+00> : vector<8x6x128xf32>
    %14 = tpu.matmul %12, %13, %cst_4 {dimension_numbers = #tpu.dot_dimension_numbers<[2], [0], [0, 1], [1], [0, 0, 0, 1, 1, 1], [], []>} : vector<8x6x56xbf16>, vector<56x128xbf16>, vector<8x6x128xf32> -> vector<8x6x128xf32>
    %c168 = arith.constant 168 : index
    %c0_5 = arith.constant 0 : index
    %15 = vector.load %arg2[%c168, %c0_5] : memref<176x128xf32, #tpu.memory_space<vmem>>, vector<1x128xf32>
    %16 = vector.shape_cast %15 : vector<1x128xf32> to vector<1x1x128xf32>
    %17 = vector.broadcast %16 : vector<1x1x128xf32> to vector<8x6x128xf32>
    %18 = arith.addf %14, %17 : vector<8x6x128xf32>
    %c0_6 = arith.constant 0 : index
    %c0_7 = arith.constant 0 : index
    %c0_8 = arith.constant 0 : index
    %19 = vector.load %arg4[%c0_6, %c0_7, %c0_8] : memref<8x6x128xf32, #tpu.memory_space<vmem>>, vector<8x6x128xf32>
    tpu.vector_store %arg4[%c0_6, %c0_7, %c0_8], %18 {strides = array<i32>} : memref<8x6x128xf32, #tpu.memory_space<vmem>>, vector<8x6x128xf32>,
    %c72 = arith.constant 72 : index
    %c0_9 = arith.constant 0 : index
    %20 = vector.load %arg2[%c72, %c0_9] : memref<176x128xf32, #tpu.memory_space<vmem>>, vector<32x128xf32>
    %21 = arith.truncf %20 : vector<32x128xf32> to vector<32x128xbf16>
    %22 = tpu.iota {dimensions = array<i32: 1>} : vector<6x128xi32>
    %c64_i32 = arith.constant 64 : i32
    %23 = vector.broadcast %c64_i32 : i32 to vector<6x128xi32>
    %24 = arith.cmpi sge, %22, %23 : vector<6x128xi32>
    %c96_i32 = arith.constant 96 : i32
    %25 = vector.broadcast %c96_i32 : i32 to vector<6x128xi32>
    %26 = arith.cmpi slt, %22, %25 : vector<6x128xi32>
    %27 = arith.andi %24, %26 : vector<6x128xi1>
    %cst_10 = arith.constant 0.000000e+00 : f32
    %28 = vector.broadcast %cst_10 : f32 to vector<6x32xf32>
    %cst_11 = arith.constant -1.000000e+30 : f32
    %29 = vector.broadcast %cst_11 : f32 to vector<2x32xf32>
    %c0_i32 = arith.constant 0 : i32
    %30 = arith.index_cast %c0_i32 : i32 to index
    %c0_12 = arith.constant 0 : index
    %c0_13 = arith.constant 0 : index
    %31 = vector.load %arg4[%30, %c0_12, %c0_13] : memref<8x6x128xf32, #tpu.memory_space<vmem>>, vector<1x6x128xf32>
    %32 = vector.shape_cast %31 : vector<1x6x128xf32> to vector<6x128xf32>
    %33 = arith.truncf %28 : vector<6x32xf32> to vector<6x32xbf16>
    %cst_14 = arith.constant dense<0.000000e+00> : vector<6x128xf32>
    %34 = tpu.matmul %33, %21, %cst_14 {dimension_numbers = #tpu.dot_dimension_numbers<[1], [0], [0], [1], [0, 0, 1, 1], [], []>} : vector<6x32xbf16>, vector<32x128xbf16>, vector<6x128xf32> -> vector<6x128xf32>
    %35 = arith.addf %32, %34 : vector<6x128xf32>
    %36 = math.tanh %35 : vector<6x128xf32>
    %37 = arith.negf %35 : vector<6x128xf32>
    %38 = math.exp %37 : vector<6x128xf32>
    %cst_15 = arith.constant 1.000000e+00 : f32
    %39 = vector.broadcast %cst_15 : f32 to vector<6x128xf32>
    %40 = arith.addf %39, %38 : vector<6x128xf32>
    %41 = arith.divf %39, %40 : vector<6x128xf32>
    %42 = arith.select %27, %36, %41 : vector<6x128xi1>, vector<6x128xf32>
    %43 = vector.extract_strided_slice %42 {offsets = [0, 0], sizes = [6, 32], strides = [1, 1]} : vector<6x128xf32> to vector<6x32xf32>
    %44 = vector.extract_strided_slice %42 {offsets = [0, 32], sizes = [6, 32], strides = [1, 1]} : vector<6x128xf32> to vector<6x32xf32>
    %45 = vector.extract_strided_slice %42 {offsets = [0, 64], sizes = [6, 32], strides = [1, 1]} : vector<6x128xf32> to vector<6x32xf32>
    %46 = vector.extract_strided_slice %42 {offsets = [0, 96], sizes = [6, 32], strides = [1, 1]} : vector<6x128xf32> to vector<6x32xf32>
    %47 = arith.mulf %44, %28 : vector<6x32xf32>
    %48 = arith.mulf %43, %45 : vector<6x32xf32>
    %49 = arith.addf %47, %48 : vector<6x32xf32>
    %50 = math.tanh %49 : vector<6x32xf32>
    %51 = arith.mulf %46, %50 : vector<6x32xf32>
    %52 = vector.extract_strided_slice %51 {offsets = [2, 0], sizes = [4, 32], strides = [1, 1]} : vector<6x32xf32> to vector<4x32xf32>
    %53 = arith.index_cast %c0_i32 : i32 to index
    %c0_16 = arith.constant 0 : index
    %c0_17 = arith.constant 0 : index
    %54 = vector.load %arg5[%53, %c0_16, %c0_17] : memref<8x4x32xf32, #tpu.memory_space<vmem>>, vector<1x4x32xf32>
    %55 = vector.shape_cast %54 : vector<1x4x32xf32> to vector<4x32xf32>
    %56 = vector.shape_cast %52 : vector<4x32xf32> to vector<1x4x32xf32>
    tpu.vector_store %arg5[%53, %c0_16, %c0_17], %56 {strides = array<i32>} : memref<8x4x32xf32, #tpu.memory_space<vmem>>, vector<1x4x32xf32>,
    %c8_i32 = arith.constant 8 : i32
    %57 = arith.cmpi slt, %c0_i32, %c8_i32 : i32
    %cst_18 = arith.constant 0.000000e+00 : f32
    %cst_19 = arith.constant -1.000000e+30 : f32
    %58 = arith.select %57, %cst_18, %cst_19 : f32
    %59 = vector.extract_strided_slice %51 {offsets = [0, 0], sizes = [2, 32], strides = [1, 1]} : vector<6x32xf32> to vector<2x32xf32>
    %60 = arith.index_cast %c0_i32 : i32 to index
    %c0_20 = arith.constant 0 : index
    %c0_21 = arith.constant 0 : index
    %61 = vector.load %arg1[%60, %c0_20, %c0_21] : memref<8x2x1xf32, #tpu.memory_space<vmem>>, vector<1x2x1xf32>
    %62 = vector.shape_cast %61 : vector<1x2x1xf32> to vector<2x1xf32>
    %63 = vector.broadcast %62 : vector<2x1xf32> to vector<2x32xf32>
    %64 = arith.mulf %59, %63 : vector<2x32xf32>
    %65 = vector.broadcast %58 : f32 to vector<2x32xf32>
    %66 = arith.addf %64, %65 : vector<2x32xf32>
    %67 = arith.maximumf %29, %66 : vector<2x32xf32>
    %c1_i32 = arith.constant 1 : i32
    %68 = arith.index_cast %c1_i32 : i32 to index
    %c0_22 = arith.constant 0 : index
    %c0_23 = arith.constant 0 : index
    %69 = vector.load %arg4[%68, %c0_22, %c0_23] : memref<8x6x128xf32, #tpu.memory_space<vmem>>, vector<1x6x128xf32>
    %70 = vector.shape_cast %69 : vector<1x6x128xf32> to vector<6x128xf32>
    %71 = arith.truncf %51 : vector<6x32xf32> to vector<6x32xbf16>
    %cst_24 = arith.constant dense<0.000000e+00> : vector<6x128xf32>
    %72 = tpu.matmul %71, %21, %cst_24 {dimension_numbers = #tpu.dot_dimension_numbers<[1], [0], [0], [1], [0, 0, 1, 1], [], []>} : vector<6x32xbf16>, vector<32x128xbf16>, vector<6x128xf32> -> vector<6x128xf32>
    %73 = arith.addf %70, %72 : vector<6x128xf32>
    %74 = math.tanh %73 : vector<6x128xf32>
    %75 = arith.negf %73 : vector<6x128xf32>
    %76 = math.exp %75 : vector<6x128xf32>
    %cst_25 = arith.constant 1.000000e+00 : f32
    %77 = vector.broadcast %cst_25 : f32 to vector<6x128xf32>
    %78 = arith.addf %77, %76 : vector<6x128xf32>
    %79 = arith.divf %77, %78 : vector<6x128xf32>
    %80 = arith.select %27, %74, %79 : vector<6x128xi1>, vector<6x128xf32>
    %81 = vector.extract_strided_slice %80 {offsets = [0, 0], sizes = [6, 32], strides = [1, 1]} : vector<6x128xf32> to vector<6x32xf32>
    %82 = vector.extract_strided_slice %80 {offsets = [0, 32], sizes = [6, 32], strides = [1, 1]} : vector<6x128xf32> to vector<6x32xf32>
    %83 = vector.extract_strided_slice %80 {offsets = [0, 64], sizes = [6, 32], strides = [1, 1]} : vector<6x128xf32> to vector<6x32xf32>
    %84 = vector.extract_strided_slice %80 {offsets = [0, 96], sizes = [6, 32], strides = [1, 1]} : vector<6x128xf32> to vector<6x32xf32>
    %85 = arith.mulf %82, %49 : vector<6x32xf32>
    %86 = arith.mulf %81, %83 : vector<6x32xf32>
    %87 = arith.addf %85, %86 : vector<6x32xf32>
    %88 = math.tanh %87 : vector<6x32xf32>
    %89 = arith.mulf %84, %88 : vector<6x32xf32>
    %90 = vector.extract_strided_slice %89 {offsets = [2, 0], sizes = [4, 32], strides = [1, 1]} : vector<6x32xf32> to vector<4x32xf32>
    %91 = arith.index_cast %c1_i32 : i32 to index
    %c0_26 = arith.constant 0 : index
    %c0_27 = arith.constant 0 : index
    %92 = vector.load %arg5[%91, %c0_26, %c0_27] : memref<8x4x32xf32, #tpu.memory_space<vmem>>, vector<1x4x32xf32>
    %93 = vector.shape_cast %92 : vector<1x4x32xf32> to vector<4x32xf32>
    %94 = vector.shape_cast %90 : vector<4x32xf32> to vector<1x4x32xf32>
    tpu.vector_store %arg5[%91, %c0_26, %c0_27], %94 {strides = array<i32>} : memref<8x4x32xf32, #tpu.memory_space<vmem>>, vector<1x4x32xf32>,
    %c8_i32_28 = arith.constant 8 : i32
    %95 = arith.cmpi slt, %c1_i32, %c8_i32_28 : i32
    %cst_29 = arith.constant 0.000000e+00 : f32
    %cst_30 = arith.constant -1.000000e+30 : f32
    %96 = arith.select %95, %cst_29, %cst_30 : f32
    %97 = vector.extract_strided_slice %89 {offsets = [0, 0], sizes = [2, 32], strides = [1, 1]} : vector<6x32xf32> to vector<2x32xf32>
    %98 = arith.index_cast %c1_i32 : i32 to index
    %c0_31 = arith.constant 0 : index
    %c0_32 = arith.constant 0 : index
    %99 = vector.load %arg1[%98, %c0_31, %c0_32] : memref<8x2x1xf32, #tpu.memory_space<vmem>>, vector<1x2x1xf32>
    %100 = vector.shape_cast %99 : vector<1x2x1xf32> to vector<2x1xf32>
    %101 = vector.broadcast %100 : vector<2x1xf32> to vector<2x32xf32>
    %102 = arith.mulf %97, %101 : vector<2x32xf32>
    %103 = vector.broadcast %96 : f32 to vector<2x32xf32>
    %104 = arith.addf %102, %103 : vector<2x32xf32>
    %105 = arith.maximumf %67, %104 : vector<2x32xf32>
    %c2_i32 = arith.constant 2 : i32
    %106 = arith.index_cast %c2_i32 : i32 to index
    %c0_33 = arith.constant 0 : index
    %c0_34 = arith.constant 0 : index
    %107 = vector.load %arg4[%106, %c0_33, %c0_34] : memref<8x6x128xf32, #tpu.memory_space<vmem>>, vector<1x6x128xf32>
    %108 = vector.shape_cast %107 : vector<1x6x128xf32> to vector<6x128xf32>
    %109 = arith.truncf %89 : vector<6x32xf32> to vector<6x32xbf16>
    %cst_35 = arith.constant dense<0.000000e+00> : vector<6x128xf32>
    %110 = tpu.matmul %109, %21, %cst_35 {dimension_numbers = #tpu.dot_dimension_numbers<[1], [0], [0], [1], [0, 0, 1, 1], [], []>} : vector<6x32xbf16>, vector<32x128xbf16>, vector<6x128xf32> -> vector<6x128xf32>
    %111 = arith.addf %108, %110 : vector<6x128xf32>
    %112 = math.tanh %111 : vector<6x128xf32>
    %113 = arith.negf %111 : vector<6x128xf32>
    %114 = math.exp %113 : vector<6x128xf32>
    %cst_36 = arith.constant 1.000000e+00 : f32
    %115 = vector.broadcast %cst_36 : f32 to vector<6x128xf32>
    %116 = arith.addf %115, %114 : vector<6x128xf32>
    %117 = arith.divf %115, %116 : vector<6x128xf32>
    %118 = arith.select %27, %112, %117 : vector<6x128xi1>, vector<6x128xf32>
    %119 = vector.extract_strided_slice %118 {offsets = [0, 0], sizes = [6, 32], strides = [1, 1]} : vector<6x128xf32> to vector<6x32xf32>
    %120 = vector.extract_strided_slice %118 {offsets = [0, 32], sizes = [6, 32], strides = [1, 1]} : vector<6x128xf32> to vector<6x32xf32>
    %121 = vector.extract_strided_slice %118 {offsets = [0, 64], sizes = [6, 32], strides = [1, 1]} : vector<6x128xf32> to vector<6x32xf32>
    %122 = vector.extract_strided_slice %118 {offsets = [0, 96], sizes = [6, 32], strides = [1, 1]} : vector<6x128xf32> to vector<6x32xf32>
    %123 = arith.mulf %120, %87 : vector<6x32xf32>
    %124 = arith.mulf %119, %121 : vector<6x32xf32>
    %125 = arith.addf %123, %124 : vector<6x32xf32>
    %126 = math.tanh %125 : vector<6x32xf32>
    %127 = arith.mulf %122, %126 : vector<6x32xf32>
    %128 = vector.extract_strided_slice %127 {offsets = [2, 0], sizes = [4, 32], strides = [1, 1]} : vector<6x32xf32> to vector<4x32xf32>
    %129 = arith.index_cast %c2_i32 : i32 to index
    %c0_37 = arith.constant 0 : index
    %c0_38 = arith.constant 0 : index
    %130 = vector.load %arg5[%129, %c0_37, %c0_38] : memref<8x4x32xf32, #tpu.memory_space<vmem>>, vector<1x4x32xf32>
    %131 = vector.shape_cast %130 : vector<1x4x32xf32> to vector<4x32xf32>
    %132 = vector.shape_cast %128 : vector<4x32xf32> to vector<1x4x32xf32>
    tpu.vector_store %arg5[%129, %c0_37, %c0_38], %132 {strides = array<i32>} : memref<8x4x32xf32, #tpu.memory_space<vmem>>, vector<1x4x32xf32>,
    %c8_i32_39 = arith.constant 8 : i32
    %133 = arith.cmpi slt, %c2_i32, %c8_i32_39 : i32
    %cst_40 = arith.constant 0.000000e+00 : f32
    %cst_41 = arith.constant -1.000000e+30 : f32
    %134 = arith.select %133, %cst_40, %cst_41 : f32
    %135 = vector.extract_strided_slice %127 {offsets = [0, 0], sizes = [2, 32], strides = [1, 1]} : vector<6x32xf32> to vector<2x32xf32>
    %136 = arith.index_cast %c2_i32 : i32 to index
    %c0_42 = arith.constant 0 : index
    %c0_43 = arith.constant 0 : index
    %137 = vector.load %arg1[%136, %c0_42, %c0_43] : memref<8x2x1xf32, #tpu.memory_space<vmem>>, vector<1x2x1xf32>
    %138 = vector.shape_cast %137 : vector<1x2x1xf32> to vector<2x1xf32>
    %139 = vector.broadcast %138 : vector<2x1xf32> to vector<2x32xf32>
    %140 = arith.mulf %135, %139 : vector<2x32xf32>
    %141 = vector.broadcast %134 : f32 to vector<2x32xf32>
    %142 = arith.addf %140, %141 : vector<2x32xf32>
    %143 = arith.maximumf %105, %142 : vector<2x32xf32>
    %c3_i32 = arith.constant 3 : i32
    %144 = arith.index_cast %c3_i32 : i32 to index
    %c0_44 = arith.constant 0 : index
    %c0_45 = arith.constant 0 : index
    %145 = vector.load %arg4[%144, %c0_44, %c0_45] : memref<8x6x128xf32, #tpu.memory_space<vmem>>, vector<1x6x128xf32>
    %146 = vector.shape_cast %145 : vector<1x6x128xf32> to vector<6x128xf32>
    %147 = arith.truncf %127 : vector<6x32xf32> to vector<6x32xbf16>
    %cst_46 = arith.constant dense<0.000000e+00> : vector<6x128xf32>
    %148 = tpu.matmul %147, %21, %cst_46 {dimension_numbers = #tpu.dot_dimension_numbers<[1], [0], [0], [1], [0, 0, 1, 1], [], []>} : vector<6x32xbf16>, vector<32x128xbf16>, vector<6x128xf32> -> vector<6x128xf32>
    %149 = arith.addf %146, %148 : vector<6x128xf32>
    %150 = math.tanh %149 : vector<6x128xf32>
    %151 = arith.negf %149 : vector<6x128xf32>
    %152 = math.exp %151 : vector<6x128xf32>
    %cst_47 = arith.constant 1.000000e+00 : f32
    %153 = vector.broadcast %cst_47 : f32 to vector<6x128xf32>
    %154 = arith.addf %153, %152 : vector<6x128xf32>
    %155 = arith.divf %153, %154 : vector<6x128xf32>
    %156 = arith.select %27, %150, %155 : vector<6x128xi1>, vector<6x128xf32>
    %157 = vector.extract_strided_slice %156 {offsets = [0, 0], sizes = [6, 32], strides = [1, 1]} : vector<6x128xf32> to vector<6x32xf32>
    %158 = vector.extract_strided_slice %156 {offsets = [0, 32], sizes = [6, 32], strides = [1, 1]} : vector<6x128xf32> to vector<6x32xf32>
    %159 = vector.extract_strided_slice %156 {offsets = [0, 64], sizes = [6, 32], strides = [1, 1]} : vector<6x128xf32> to vector<6x32xf32>
    %160 = vector.extract_strided_slice %156 {offsets = [0, 96], sizes = [6, 32], strides = [1, 1]} : vector<6x128xf32> to vector<6x32xf32>
    %161 = arith.mulf %158, %125 : vector<6x32xf32>
    %162 = arith.mulf %157, %159 : vector<6x32xf32>
    %163 = arith.addf %161, %162 : vector<6x32xf32>
    %164 = math.tanh %163 : vector<6x32xf32>
    %165 = arith.mulf %160, %164 : vector<6x32xf32>
    %166 = vector.extract_strided_slice %165 {offsets = [2, 0], sizes = [4, 32], strides = [1, 1]} : vector<6x32xf32> to vector<4x32xf32>
    %167 = arith.index_cast %c3_i32 : i32 to index
    %c0_48 = arith.constant 0 : index
    %c0_49 = arith.constant 0 : index
    %168 = vector.load %arg5[%167, %c0_48, %c0_49] : memref<8x4x32xf32, #tpu.memory_space<vmem>>, vector<1x4x32xf32>
    %169 = vector.shape_cast %168 : vector<1x4x32xf32> to vector<4x32xf32>
    %170 = vector.shape_cast %166 : vector<4x32xf32> to vector<1x4x32xf32>
    tpu.vector_store %arg5[%167, %c0_48, %c0_49], %170 {strides = array<i32>} : memref<8x4x32xf32, #tpu.memory_space<vmem>>, vector<1x4x32xf32>,
    %c8_i32_50 = arith.constant 8 : i32
    %171 = arith.cmpi slt, %c3_i32, %c8_i32_50 : i32
    %cst_51 = arith.constant 0.000000e+00 : f32
    %cst_52 = arith.constant -1.000000e+30 : f32
    %172 = arith.select %171, %cst_51, %cst_52 : f32
    %173 = vector.extract_strided_slice %165 {offsets = [0, 0], sizes = [2, 32], strides = [1, 1]} : vector<6x32xf32> to vector<2x32xf32>
    %174 = arith.index_cast %c3_i32 : i32 to index
    %c0_53 = arith.constant 0 : index
    %c0_54 = arith.constant 0 : index
    %175 = vector.load %arg1[%174, %c0_53, %c0_54] : memref<8x2x1xf32, #tpu.memory_space<vmem>>, vector<1x2x1xf32>
    %176 = vector.shape_cast %175 : vector<1x2x1xf32> to vector<2x1xf32>
    %177 = vector.broadcast %176 : vector<2x1xf32> to vector<2x32xf32>
    %178 = arith.mulf %173, %177 : vector<2x32xf32>
    %179 = vector.broadcast %172 : f32 to vector<2x32xf32>
    %180 = arith.addf %178, %179 : vector<2x32xf32>
    %181 = arith.maximumf %143, %180 : vector<2x32xf32>
    %c4_i32 = arith.constant 4 : i32
    %182 = arith.index_cast %c4_i32 : i32 to index
    %c0_55 = arith.constant 0 : index
    %c0_56 = arith.constant 0 : index
    %183 = vector.load %arg4[%182, %c0_55, %c0_56] : memref<8x6x128xf32, #tpu.memory_space<vmem>>, vector<1x6x128xf32>
    %184 = vector.shape_cast %183 : vector<1x6x128xf32> to vector<6x128xf32>
    %185 = arith.truncf %165 : vector<6x32xf32> to vector<6x32xbf16>
    %cst_57 = arith.constant dense<0.000000e+00> : vector<6x128xf32>
    %186 = tpu.matmul %185, %21, %cst_57 {dimension_numbers = #tpu.dot_dimension_numbers<[1], [0], [0], [1], [0, 0, 1, 1], [], []>} : vector<6x32xbf16>, vector<32x128xbf16>, vector<6x128xf32> -> vector<6x128xf32>
    %187 = arith.addf %184, %186 : vector<6x128xf32>
    %188 = math.tanh %187 : vector<6x128xf32>
    %189 = arith.negf %187 : vector<6x128xf32>
    %190 = math.exp %189 : vector<6x128xf32>
    %cst_58 = arith.constant 1.000000e+00 : f32
    %191 = vector.broadcast %cst_58 : f32 to vector<6x128xf32>
    %192 = arith.addf %191, %190 : vector<6x128xf32>
    %193 = arith.divf %191, %192 : vector<6x128xf32>
    %194 = arith.select %27, %188, %193 : vector<6x128xi1>, vector<6x128xf32>
    %195 = vector.extract_strided_slice %194 {offsets = [0, 0], sizes = [6, 32], strides = [1, 1]} : vector<6x128xf32> to vector<6x32xf32>
    %196 = vector.extract_strided_slice %194 {offsets = [0, 32], sizes = [6, 32], strides = [1, 1]} : vector<6x128xf32> to vector<6x32xf32>
    %197 = vector.extract_strided_slice %194 {offsets = [0, 64], sizes = [6, 32], strides = [1, 1]} : vector<6x128xf32> to vector<6x32xf32>
    %198 = vector.extract_strided_slice %194 {offsets = [0, 96], sizes = [6, 32], strides = [1, 1]} : vector<6x128xf32> to vector<6x32xf32>
    %199 = arith.mulf %196, %163 : vector<6x32xf32>
    %200 = arith.mulf %195, %197 : vector<6x32xf32>
    %201 = arith.addf %199, %200 : vector<6x32xf32>
    %202 = math.tanh %201 : vector<6x32xf32>
    %203 = arith.mulf %198, %202 : vector<6x32xf32>
    %204 = vector.extract_strided_slice %203 {offsets = [2, 0], sizes = [4, 32], strides = [1, 1]} : vector<6x32xf32> to vector<4x32xf32>
    %205 = arith.index_cast %c4_i32 : i32 to index
    %c0_59 = arith.constant 0 : index
    %c0_60 = arith.constant 0 : index
    %206 = vector.load %arg5[%205, %c0_59, %c0_60] : memref<8x4x32xf32, #tpu.memory_space<vmem>>, vector<1x4x32xf32>
    %207 = vector.shape_cast %206 : vector<1x4x32xf32> to vector<4x32xf32>
    %208 = vector.shape_cast %204 : vector<4x32xf32> to vector<1x4x32xf32>
    tpu.vector_store %arg5[%205, %c0_59, %c0_60], %208 {strides = array<i32>} : memref<8x4x32xf32, #tpu.memory_space<vmem>>, vector<1x4x32xf32>,
    %c8_i32_61 = arith.constant 8 : i32
    %209 = arith.cmpi slt, %c4_i32, %c8_i32_61 : i32
    %cst_62 = arith.constant 0.000000e+00 : f32
    %cst_63 = arith.constant -1.000000e+30 : f32
    %210 = arith.select %209, %cst_62, %cst_63 : f32
    %211 = vector.extract_strided_slice %203 {offsets = [0, 0], sizes = [2, 32], strides = [1, 1]} : vector<6x32xf32> to vector<2x32xf32>
    %212 = arith.index_cast %c4_i32 : i32 to index
    %c0_64 = arith.constant 0 : index
    %c0_65 = arith.constant 0 : index
    %213 = vector.load %arg1[%212, %c0_64, %c0_65] : memref<8x2x1xf32, #tpu.memory_space<vmem>>, vector<1x2x1xf32>
    %214 = vector.shape_cast %213 : vector<1x2x1xf32> to vector<2x1xf32>
    %215 = vector.broadcast %214 : vector<2x1xf32> to vector<2x32xf32>
    %216 = arith.mulf %211, %215 : vector<2x32xf32>
    %217 = vector.broadcast %210 : f32 to vector<2x32xf32>
    %218 = arith.addf %216, %217 : vector<2x32xf32>
    %219 = arith.maximumf %181, %218 : vector<2x32xf32>
    %c5_i32 = arith.constant 5 : i32
    %220 = arith.index_cast %c5_i32 : i32 to index
    %c0_66 = arith.constant 0 : index
    %c0_67 = arith.constant 0 : index
    %221 = vector.load %arg4[%220, %c0_66, %c0_67] : memref<8x6x128xf32, #tpu.memory_space<vmem>>, vector<1x6x128xf32>
    %222 = vector.shape_cast %221 : vector<1x6x128xf32> to vector<6x128xf32>
    %223 = arith.truncf %203 : vector<6x32xf32> to vector<6x32xbf16>
    %cst_68 = arith.constant dense<0.000000e+00> : vector<6x128xf32>
    %224 = tpu.matmul %223, %21, %cst_68 {dimension_numbers = #tpu.dot_dimension_numbers<[1], [0], [0], [1], [0, 0, 1, 1], [], []>} : vector<6x32xbf16>, vector<32x128xbf16>, vector<6x128xf32> -> vector<6x128xf32>
    %225 = arith.addf %222, %224 : vector<6x128xf32>
    %226 = math.tanh %225 : vector<6x128xf32>
    %227 = arith.negf %225 : vector<6x128xf32>
    %228 = math.exp %227 : vector<6x128xf32>
    %cst_69 = arith.constant 1.000000e+00 : f32
    %229 = vector.broadcast %cst_69 : f32 to vector<6x128xf32>
    %230 = arith.addf %229, %228 : vector<6x128xf32>
    %231 = arith.divf %229, %230 : vector<6x128xf32>
    %232 = arith.select %27, %226, %231 : vector<6x128xi1>, vector<6x128xf32>
    %233 = vector.extract_strided_slice %232 {offsets = [0, 0], sizes = [6, 32], strides = [1, 1]} : vector<6x128xf32> to vector<6x32xf32>
    %234 = vector.extract_strided_slice %232 {offsets = [0, 32], sizes = [6, 32], strides = [1, 1]} : vector<6x128xf32> to vector<6x32xf32>
    %235 = vector.extract_strided_slice %232 {offsets = [0, 64], sizes = [6, 32], strides = [1, 1]} : vector<6x128xf32> to vector<6x32xf32>
    %236 = vector.extract_strided_slice %232 {offsets = [0, 96], sizes = [6, 32], strides = [1, 1]} : vector<6x128xf32> to vector<6x32xf32>
    %237 = arith.mulf %234, %201 : vector<6x32xf32>
    %238 = arith.mulf %233, %235 : vector<6x32xf32>
    %239 = arith.addf %237, %238 : vector<6x32xf32>
    %240 = math.tanh %239 : vector<6x32xf32>
    %241 = arith.mulf %236, %240 : vector<6x32xf32>
    %242 = vector.extract_strided_slice %241 {offsets = [2, 0], sizes = [4, 32], strides = [1, 1]} : vector<6x32xf32> to vector<4x32xf32>
    %243 = arith.index_cast %c5_i32 : i32 to index
    %c0_70 = arith.constant 0 : index
    %c0_71 = arith.constant 0 : index
    %244 = vector.load %arg5[%243, %c0_70, %c0_71] : memref<8x4x32xf32, #tpu.memory_space<vmem>>, vector<1x4x32xf32>
    %245 = vector.shape_cast %244 : vector<1x4x32xf32> to vector<4x32xf32>
    %246 = vector.shape_cast %242 : vector<4x32xf32> to vector<1x4x32xf32>
    tpu.vector_store %arg5[%243, %c0_70, %c0_71], %246 {strides = array<i32>} : memref<8x4x32xf32, #tpu.memory_space<vmem>>, vector<1x4x32xf32>,
    %c8_i32_72 = arith.constant 8 : i32
    %247 = arith.cmpi slt, %c5_i32, %c8_i32_72 : i32
    %cst_73 = arith.constant 0.000000e+00 : f32
    %cst_74 = arith.constant -1.000000e+30 : f32
    %248 = arith.select %247, %cst_73, %cst_74 : f32
    %249 = vector.extract_strided_slice %241 {offsets = [0, 0], sizes = [2, 32], strides = [1, 1]} : vector<6x32xf32> to vector<2x32xf32>
    %250 = arith.index_cast %c5_i32 : i32 to index
    %c0_75 = arith.constant 0 : index
    %c0_76 = arith.constant 0 : index
    %251 = vector.load %arg1[%250, %c0_75, %c0_76] : memref<8x2x1xf32, #tpu.memory_space<vmem>>, vector<1x2x1xf32>
    %252 = vector.shape_cast %251 : vector<1x2x1xf32> to vector<2x1xf32>
    %253 = vector.broadcast %252 : vector<2x1xf32> to vector<2x32xf32>
    %254 = arith.mulf %249, %253 : vector<2x32xf32>
    %255 = vector.broadcast %248 : f32 to vector<2x32xf32>
    %256 = arith.addf %254, %255 : vector<2x32xf32>
    %257 = arith.maximumf %219, %256 : vector<2x32xf32>
    %c6_i32 = arith.constant 6 : i32
    %258 = arith.index_cast %c6_i32 : i32 to index
    %c0_77 = arith.constant 0 : index
    %c0_78 = arith.constant 0 : index
    %259 = vector.load %arg4[%258, %c0_77, %c0_78] : memref<8x6x128xf32, #tpu.memory_space<vmem>>, vector<1x6x128xf32>
    %260 = vector.shape_cast %259 : vector<1x6x128xf32> to vector<6x128xf32>
    %261 = arith.truncf %241 : vector<6x32xf32> to vector<6x32xbf16>
    %cst_79 = arith.constant dense<0.000000e+00> : vector<6x128xf32>
    %262 = tpu.matmul %261, %21, %cst_79 {dimension_numbers = #tpu.dot_dimension_numbers<[1], [0], [0], [1], [0, 0, 1, 1], [], []>} : vector<6x32xbf16>, vector<32x128xbf16>, vector<6x128xf32> -> vector<6x128xf32>
    %263 = arith.addf %260, %262 : vector<6x128xf32>
    %264 = math.tanh %263 : vector<6x128xf32>
    %265 = arith.negf %263 : vector<6x128xf32>
    %266 = math.exp %265 : vector<6x128xf32>
    %cst_80 = arith.constant 1.000000e+00 : f32
    %267 = vector.broadcast %cst_80 : f32 to vector<6x128xf32>
    %268 = arith.addf %267, %266 : vector<6x128xf32>
    %269 = arith.divf %267, %268 : vector<6x128xf32>
    %270 = arith.select %27, %264, %269 : vector<6x128xi1>, vector<6x128xf32>
    %271 = vector.extract_strided_slice %270 {offsets = [0, 0], sizes = [6, 32], strides = [1, 1]} : vector<6x128xf32> to vector<6x32xf32>
    %272 = vector.extract_strided_slice %270 {offsets = [0, 32], sizes = [6, 32], strides = [1, 1]} : vector<6x128xf32> to vector<6x32xf32>
    %273 = vector.extract_strided_slice %270 {offsets = [0, 64], sizes = [6, 32], strides = [1, 1]} : vector<6x128xf32> to vector<6x32xf32>
    %274 = vector.extract_strided_slice %270 {offsets = [0, 96], sizes = [6, 32], strides = [1, 1]} : vector<6x128xf32> to vector<6x32xf32>
    %275 = arith.mulf %272, %239 : vector<6x32xf32>
    %276 = arith.mulf %271, %273 : vector<6x32xf32>
    %277 = arith.addf %275, %276 : vector<6x32xf32>
    %278 = math.tanh %277 : vector<6x32xf32>
    %279 = arith.mulf %274, %278 : vector<6x32xf32>
    %280 = vector.extract_strided_slice %279 {offsets = [2, 0], sizes = [4, 32], strides = [1, 1]} : vector<6x32xf32> to vector<4x32xf32>
    %281 = arith.index_cast %c6_i32 : i32 to index
    %c0_81 = arith.constant 0 : index
    %c0_82 = arith.constant 0 : index
    %282 = vector.load %arg5[%281, %c0_81, %c0_82] : memref<8x4x32xf32, #tpu.memory_space<vmem>>, vector<1x4x32xf32>
    %283 = vector.shape_cast %282 : vector<1x4x32xf32> to vector<4x32xf32>
    %284 = vector.shape_cast %280 : vector<4x32xf32> to vector<1x4x32xf32>
    tpu.vector_store %arg5[%281, %c0_81, %c0_82], %284 {strides = array<i32>} : memref<8x4x32xf32, #tpu.memory_space<vmem>>, vector<1x4x32xf32>,
    %c8_i32_83 = arith.constant 8 : i32
    %285 = arith.cmpi slt, %c6_i32, %c8_i32_83 : i32
    %cst_84 = arith.constant 0.000000e+00 : f32
    %cst_85 = arith.constant -1.000000e+30 : f32
    %286 = arith.select %285, %cst_84, %cst_85 : f32
    %287 = vector.extract_strided_slice %279 {offsets = [0, 0], sizes = [2, 32], strides = [1, 1]} : vector<6x32xf32> to vector<2x32xf32>
    %288 = arith.index_cast %c6_i32 : i32 to index
    %c0_86 = arith.constant 0 : index
    %c0_87 = arith.constant 0 : index
    %289 = vector.load %arg1[%288, %c0_86, %c0_87] : memref<8x2x1xf32, #tpu.memory_space<vmem>>, vector<1x2x1xf32>
    %290 = vector.shape_cast %289 : vector<1x2x1xf32> to vector<2x1xf32>
    %291 = vector.broadcast %290 : vector<2x1xf32> to vector<2x32xf32>
    %292 = arith.mulf %287, %291 : vector<2x32xf32>
    %293 = vector.broadcast %286 : f32 to vector<2x32xf32>
    %294 = arith.addf %292, %293 : vector<2x32xf32>
    %295 = arith.maximumf %257, %294 : vector<2x32xf32>
    %c7_i32 = arith.constant 7 : i32
    %296 = arith.index_cast %c7_i32 : i32 to index
    %c0_88 = arith.constant 0 : index
    %c0_89 = arith.constant 0 : index
    %297 = vector.load %arg4[%296, %c0_88, %c0_89] : memref<8x6x128xf32, #tpu.memory_space<vmem>>, vector<1x6x128xf32>
    %298 = vector.shape_cast %297 : vector<1x6x128xf32> to vector<6x128xf32>
    %299 = arith.truncf %279 : vector<6x32xf32> to vector<6x32xbf16>
    %cst_90 = arith.constant dense<0.000000e+00> : vector<6x128xf32>
    %300 = tpu.matmul %299, %21, %cst_90 {dimension_numbers = #tpu.dot_dimension_numbers<[1], [0], [0], [1], [0, 0, 1, 1], [], []>} : vector<6x32xbf16>, vector<32x128xbf16>, vector<6x128xf32> -> vector<6x128xf32>
    %301 = arith.addf %298, %300 : vector<6x128xf32>
    %302 = math.tanh %301 : vector<6x128xf32>
    %303 = arith.negf %301 : vector<6x128xf32>
    %304 = math.exp %303 : vector<6x128xf32>
    %cst_91 = arith.constant 1.000000e+00 : f32
    %305 = vector.broadcast %cst_91 : f32 to vector<6x128xf32>
    %306 = arith.addf %305, %304 : vector<6x128xf32>
    %307 = arith.divf %305, %306 : vector<6x128xf32>
    %308 = arith.select %27, %302, %307 : vector<6x128xi1>, vector<6x128xf32>
    %309 = vector.extract_strided_slice %308 {offsets = [0, 0], sizes = [6, 32], strides = [1, 1]} : vector<6x128xf32> to vector<6x32xf32>
    %310 = vector.extract_strided_slice %308 {offsets = [0, 32], sizes = [6, 32], strides = [1, 1]} : vector<6x128xf32> to vector<6x32xf32>
    %311 = vector.extract_strided_slice %308 {offsets = [0, 64], sizes = [6, 32], strides = [1, 1]} : vector<6x128xf32> to vector<6x32xf32>
    %312 = vector.extract_strided_slice %308 {offsets = [0, 96], sizes = [6, 32], strides = [1, 1]} : vector<6x128xf32> to vector<6x32xf32>
    %313 = arith.mulf %310, %277 : vector<6x32xf32>
    %314 = arith.mulf %309, %311 : vector<6x32xf32>
    %315 = arith.addf %313, %314 : vector<6x32xf32>
    %316 = math.tanh %315 : vector<6x32xf32>
    %317 = arith.mulf %312, %316 : vector<6x32xf32>
    %318 = vector.extract_strided_slice %317 {offsets = [2, 0], sizes = [4, 32], strides = [1, 1]} : vector<6x32xf32> to vector<4x32xf32>
    %319 = arith.index_cast %c7_i32 : i32 to index
    %c0_92 = arith.constant 0 : index
    %c0_93 = arith.constant 0 : index
    %320 = vector.load %arg5[%319, %c0_92, %c0_93] : memref<8x4x32xf32, #tpu.memory_space<vmem>>, vector<1x4x32xf32>
    %321 = vector.shape_cast %320 : vector<1x4x32xf32> to vector<4x32xf32>
    %322 = vector.shape_cast %318 : vector<4x32xf32> to vector<1x4x32xf32>
    tpu.vector_store %arg5[%319, %c0_92, %c0_93], %322 {strides = array<i32>} : memref<8x4x32xf32, #tpu.memory_space<vmem>>, vector<1x4x32xf32>,
    %c8_i32_94 = arith.constant 8 : i32
    %323 = arith.cmpi slt, %c7_i32, %c8_i32_94 : i32
    %cst_95 = arith.constant 0.000000e+00 : f32
    %cst_96 = arith.constant -1.000000e+30 : f32
    %324 = arith.select %323, %cst_95, %cst_96 : f32
    %325 = vector.extract_strided_slice %317 {offsets = [0, 0], sizes = [2, 32], strides = [1, 1]} : vector<6x32xf32> to vector<2x32xf32>
    %326 = arith.index_cast %c7_i32 : i32 to index
    %c0_97 = arith.constant 0 : index
    %c0_98 = arith.constant 0 : index
    %327 = vector.load %arg1[%326, %c0_97, %c0_98] : memref<8x2x1xf32, #tpu.memory_space<vmem>>, vector<1x2x1xf32>
    %328 = vector.shape_cast %327 : vector<1x2x1xf32> to vector<2x1xf32>
    %329 = vector.broadcast %328 : vector<2x1xf32> to vector<2x32xf32>
    %330 = arith.mulf %325, %329 : vector<2x32xf32>
    %331 = vector.broadcast %324 : f32 to vector<2x32xf32>
    %332 = arith.addf %330, %331 : vector<2x32xf32>
    %333 = arith.maximumf %295, %332 : vector<2x32xf32>
    %c8_i32_99 = arith.constant 8 : i32
    %c0_100 = arith.constant 0 : index
    %c0_101 = arith.constant 0 : index
    %334 = vector.load %arg3[%c0_100, %c0_101] : memref<6x32xf32, #tpu.memory_space<vmem>>, vector<2x32xf32>
    tpu.vector_store %arg3[%c0_100, %c0_101], %333 {strides = array<i32>} : memref<6x32xf32, #tpu.memory_space<vmem>>, vector<2x32xf32>,
    %c0_102 = arith.constant 0 : index
    %c0_103 = arith.constant 0 : index
    %c0_104 = arith.constant 0 : index
    %335 = vector.load %arg5[%c0_102, %c0_103, %c0_104] : memref<8x4x32xf32, #tpu.memory_space<vmem>>, vector<8x4x32xf32>
    %336 = arith.truncf %333 : vector<2x32xf32> to vector<2x32xbf16>
    %c136 = arith.constant 136 : index
    %c0_105 = arith.constant 0 : index
    %337 = vector.load %arg2[%c136, %c0_105] : memref<176x128xf32, #tpu.memory_space<vmem>>, vector<32x128xf32>
    %338 = arith.truncf %337 : vector<32x128xf32> to vector<32x128xbf16>
    %cst_106 = arith.constant dense<0.000000e+00> : vector<2x128xf32>
    %339 = tpu.matmul %336, %338, %cst_106 {dimension_numbers = #tpu.dot_dimension_numbers<[1], [0], [0], [1], [0, 0, 1, 1], [], []>} : vector<2x32xbf16>, vector<32x128xbf16>, vector<2x128xf32> -> vector<2x128xf32>
    %c170 = arith.constant 170 : index
    %c0_107 = arith.constant 0 : index
    %340 = vector.load %arg2[%c170, %c0_107] : memref<176x128xf32, #tpu.memory_space<vmem>>, vector<1x128xf32>
    %341 = vector.broadcast %340 : vector<1x128xf32> to vector<2x128xf32>
    %342 = arith.addf %339, %341 : vector<2x128xf32>
    %343 = tpu.concatenate %342, %342 in 0 : vector<2x128xf32>, vector<2x128xf32> -> vector<4x128xf32>
    %344 = arith.truncf %335 : vector<8x4x32xf32> to vector<8x4x32xbf16>
    %c104 = arith.constant 104 : index
    %c0_108 = arith.constant 0 : index
    %345 = vector.load %arg2[%c104, %c0_108] : memref<176x128xf32, #tpu.memory_space<vmem>>, vector<32x128xf32>
    %346 = arith.truncf %345 : vector<32x128xf32> to vector<32x128xbf16>
    %cst_109 = arith.constant dense<0.000000e+00> : vector<8x4x128xf32>
    %347 = tpu.matmul %344, %346, %cst_109 {dimension_numbers = #tpu.dot_dimension_numbers<[2], [0], [0, 1], [1], [0, 0, 0, 1, 1, 1], [], []>} : vector<8x4x32xbf16>, vector<32x128xbf16>, vector<8x4x128xf32> -> vector<8x4x128xf32>
    %c169 = arith.constant 169 : index
    %c0_110 = arith.constant 0 : index
    %348 = vector.load %arg2[%c169, %c0_110] : memref<176x128xf32, #tpu.memory_space<vmem>>, vector<1x128xf32>
    %349 = vector.shape_cast %348 : vector<1x128xf32> to vector<1x1x128xf32>
    %350 = vector.broadcast %349 : vector<1x1x128xf32> to vector<8x4x128xf32>
    %351 = arith.addf %347, %350 : vector<8x4x128xf32>
    %352 = vector.shape_cast %343 : vector<4x128xf32> to vector<1x4x128xf32>
    %353 = vector.broadcast %352 : vector<1x4x128xf32> to vector<8x4x128xf32>
    %354 = arith.addf %351, %353 : vector<8x4x128xf32>
    %355 = math.tanh %354 : vector<8x4x128xf32>
    %c171 = arith.constant 171 : index
    %c0_111 = arith.constant 0 : index
    %356 = vector.load %arg2[%c171, %c0_111] : memref<176x128xf32, #tpu.memory_space<vmem>>, vector<1x128xf32>
    %357 = vector.shape_cast %356 : vector<1x128xf32> to vector<1x1x128xf32>
    %358 = vector.broadcast %357 : vector<1x1x128xf32> to vector<8x4x128xf32>
    %359 = arith.mulf %355, %358 : vector<8x4x128xf32>
    %cst_112 = arith.constant dense<0.000000e+00> : vector<8x4xf32>
    %360 = vector.multi_reduction <add>, %359, %cst_112 [2] : vector<8x4x128xf32> to vector<8x4xf32>
    %361 = vector.shape_cast %360 : vector<8x4xf32> to vector<8x4x1xf32>
    %c172 = arith.constant 172 : index
    %c0_113 = arith.constant 0 : index
    %362 = vector.load %arg2[%c172, %c0_113] : memref<176x128xf32, #tpu.memory_space<vmem>>, vector<1x1xf32>
    %363 = vector.shape_cast %362 : vector<1x1xf32> to vector<1x1x1xf32>
    %364 = vector.broadcast %363 : vector<1x1x1xf32> to vector<8x4x1xf32>
    %365 = arith.addf %361, %364 : vector<8x4x1xf32>
    %366 = math.exp %365 : vector<8x4x1xf32>
    %c172_114 = arith.constant 172 : index
    %c1 = arith.constant 1 : index
    %367 = vector.load %arg2[%c172_114, %c1] : memref<176x128xf32, #tpu.memory_space<vmem>>, vector<1x1xf32>
    %368 = vector.shape_cast %367 : vector<1x1xf32> to vector<1x1x1xf32>
    %369 = vector.broadcast %368 : vector<1x1x1xf32> to vector<8x4x1xf32>
    %370 = arith.mulf %366, %369 : vector<8x4x1xf32>
    %371 = vector.broadcast %370 : vector<8x4x1xf32> to vector<8x4x32xf32>
    %372 = arith.mulf %335, %371 : vector<8x4x32xf32>
    %373 = tpu.iota {dimensions = array<i32: 0>} : vector<8x1x1xi32>
    %c6_i32_115 = arith.constant 6 : i32
    %374 = vector.broadcast %c6_i32_115 : i32 to vector<8x1x1xi32>
    %375 = arith.cmpi slt, %373, %374 : vector<8x1x1xi32>
    %cst_116 = arith.constant -1.000000e+30 : f32
    %376 = vector.shape_cast %375 : vector<8x1x1xi1> to vector<8x1x1xi1>
    %377 = vector.broadcast %376 : vector<8x1x1xi1> to vector<8x4x32xi1>
    %378 = vector.broadcast %cst_116 : f32 to vector<8x4x32xf32>
    %379 = arith.select %377, %372, %378 : vector<8x4x32xi1>, vector<8x4x32xf32>
    %cst_117 = arith.constant dense<0xFF800000> : vector<4x32xf32>
    %380 = vector.multi_reduction <maximumf>, %379, %cst_117 [0] : vector<8x4x32xf32> to vector<4x32xf32>
    %c2 = arith.constant 2 : index
    %c0_118 = arith.constant 0 : index
    %381 = vector.load %arg3[%c2, %c0_118] : memref<6x32xf32, #tpu.memory_space<vmem>>, vector<4x32xf32>
    tpu.vector_store %arg3[%c2, %c0_118], %380 {strides = array<i32>} : memref<6x32xf32, #tpu.memory_space<vmem>>, vector<4x32xf32>,
    return
  }
}

</mosaic_0001>

<bundles_post_ra>
// kernel: forward.1
= control target key start
LH: loop header
LB: loop body
LE: loop exit
PB: predicated region body
PF: predicated region fallthrough
CT: control target
= control target key end

     0   :  { %8 = vsyncpa [#allocation5], 0  ;;  %s2369_s12 = smov [#allocation4]   ;;  %s2868_s0 = inlined_call_operand.vmem [shape: s32[8,6], index: 0, kind: input, shape index: {}]   ;;  %s2869_s1 = inlined_call_operand.vmem [shape: f32[8,2,1], index: 1, kind: input, shape index: {}]   ;;  %s2870_s2 = inlined_call_operand.hbm [shape: f32[176,128], index: 2, kind: input, shape index: {}]   ;;  %s2871_s3 = inlined_call_operand.vmem [shape: f32[6,32], index: 3, kind: output, shape index: {}]  }
   0x1   :  { %s18_s13 = sshll.u32 %s2369_s12, 4  ;;  %s2345_s16 = scalar_lea.hbm %s2870_s2, 2816  ;;  %s19_s13 = int_to_ptr.vmem [resolvable:$true] %s18_s13 }
   0x2   :  { %p2346_p0 = scmp.ne.s32.totalorder %s2870_s2, %s2345_s16  ;;  %p2349_p1 = scmp.lt.u32.totalorder %s2345_s16, %s2870_s2 }
   0x4   :  { %p2351_p2 = pnand %p2349_p1, %p2346_p0 }
   0x6   :  { %2354 = shalt.err (!%p2351_p2)
}
   0x7   :  { %s2355_s21 = scalar_lea.vmem %s19_s13, 2816  ;;  %p2360_p4 = scmp.lt.s32.totalorder %s19_s13, %s19_s13 }
   0x8   :  { %p2356_p3 = scmp.ne.s32.totalorder %s19_s13, %s2355_s21  ;;  %p2361_p5 = scmp.lt.s32.totalorder %s2355_s21, %s2355_s21 }
   0xa   :  { %p2362_p6 = por %p2361_p5, %p2360_p4 }
   0xc   :  { %p2363_p7 = pnand %p2362_p6, %p2356_p3 }
   0xe   :  { %2366 = shalt.err (!%p2363_p7)
}
   0xf   :  { %s2370_s22 = smov 128   ;;  %s2371_s23 = smov 8  }
  0x10   :  { %24 = dma.hbm_to_vmem [thread:$0]  %s2870_s2, 2816, %s19_s13, [#allocation5], %s2370_s22, %s2370_s22, %s2371_s23  }
  0x11   :  { %2367 = dma.done.wait [#allocation5], 2816  }
  0x12   :  { %2368 = vsyncadd [#allocation5], 4294964480  ;;  %v120_v0 = vlaneseq  ;;  %v2372_v1 = vmov 0.0   ;;  %v40_v3 = vld [vmem:[#allocation4 + $0x38] sm:$0xff]  ;;  %v41_v4 = vld [vmem:[#allocation4 + $0x40] sm:$0xff]  ;;  %vm43_vm0 = vcmask 130048  }
  0x13   :  { %2143 = vmatprep.subr.bf16.mxu1 %v2372_v1  ;;  %v29_v5 = vld [vmem:[#allocation4] sm:$0xff]  ;;  %v42_v8 = vpack.c.bf16 %v41_v4, %v40_v3  ;;  %v30_v9 = vld [vmem:[#allocation4 + $0x8] sm:$0xff]  ;;  %v31_v10 = vld [vmem:[#allocation4 + $0x10] sm:$0xff]  ;;  %vm2373_vm1 = vmmov 0   ;;  %v2374_v29 = vmov 0   ;;  %vm616_vm5 = vcmask 1043456  }
  0x14   :  { %v2414_v2 = vshrl.u32 %v120_v0, 7  ;;  %v32_v11 = vld [vmem:[#allocation4 + $0x18] sm:$0xff]  ;;  %v36_v12 = vpack.c.bf16 %v30_v9, %v29_v5  ;;  %v33_v13 = vld [vmem:[#allocation4 + $0x20] sm:$0xff]  ;;  %v34_v14 = vld [vmem:[#allocation4 + $0x28] sm:$0xff]  ;;  %2151 = vmatprep.mubr.msk.bf16.mxu1 %vm2373_vm1, %v2372_v1  ;;  %2255 = vset.pattern.permute.xlu0 %v2374_v29  ;;  %v2450_v32 = vand.u32 127, %v120_v0  ;;  %vm606_vm6 = vcmask 457728  }
  0x15   :  { %2133 = vmatprep.subr.bf16.mxu0 %v42_v8  ;;  %v37_v16 = vpack.c.bf16 %v32_v11, %v31_v10  ;;  %v2422_v17 = vld [vmem:[%s2868_s0] sm:$0xff]  ;;  %v38_v18 = vpack.c.bf16 %v34_v14, %v33_v13  ;;  %v35_v22 = vld [vmem:[#allocation4 + $0x30] sm:$0xff]  ;;  %v929_v24 = vld [vmem:[#allocation4 + $0x48] sm:$0xff]  ;;  %2256 = vset.pattern.permute.xlu1 %v2374_v29  ;;  %v2375_v33 = vmov 1966171168   ;;  %s2377_s0 = smov 64  }
  0x16   :  { %v125_v6 = vsub.s32 0, %v2414_v2  ;;  %v139_v7 = vsub.s32 2, %v2414_v2  ;;  %v132_v15 = vsub.s32 1, %v2414_v2  ;;  %2134 = vmatpush3.bf16.msra.mxu0 %v42_v8  ;;  %2135 = vmatprep.mubr.msk.bf16.mxu0 %vm43_vm0, %v36_v12  ;;  %v39_v23 = vpack.c.bf16 %v35_v22, %v35_v22  ;;  %v930_v25 = vld [vmem:[#allocation4 + $0x50] sm:$0xff]  ;;  %v931_v26 = vld [vmem:[#allocation4 + $0x58] sm:$0xff]  ;;  %v932_v28 = vld [vmem:[#allocation4 + $0x60] sm:$0xff] }
  0x17   :  { %2163 = vmatprep.subr.bf16.mxu0 %v2372_v1  ;;  %v2436_v27 = vpack.c.bf16 %v930_v25, %v929_v24  ;;  %v2439_v30 = vpack.c.bf16 %v932_v28, %v931_v26  ;;  %v229_v34 = vunpack.c.l.s4 %v2375_v33  ;;  %vm935_vm7 = vcmp.ge.s32.totalorder %v2450_v32, 64  ;;  %s2378_s27 = smov 32  }
  0x18   :  { %v126_v19 = vrot.slane %v2422_v17, %v125_v6  ;;  %v140_v20 = vrot.slane %v2422_v17, %v139_v7  ;;  %v133_v21 = vrot.slane %v2422_v17, %v132_v15  ;;  %vm936_vm8 = vcmp.lt.s32.totalorder %v2450_v32, 96 }
  0x19   :  { %2136 = vmatmul.mubr.msk.bf16.vlgmr.msra.gmra.mrb[0].mxu0 %vm43_vm0, %v37_v16  ;;  %v230_v37 = vunpack.c.0.s8 %v229_v34  ;;  %vm2523_vm9 = vmand %vm935_vm7, %vm936_vm8  ;;  %vm939_vm10 = vcmask 261120  }
  0x1a   :  { %128 = vbcast.lane.b32.xlu0 %v126_v19, 256  ;;  %142 = vbcast.lane.b32.xlu1 %v140_v20, 256 }
  0x1b   :  { %2139 = vmatprep.mubr.msk.bf16.mxu0 %vm43_vm0, %v38_v18  ;;  %2164 = vmatpush3.bf16.msra.mxu0 %v2436_v27  ;;  %v2459_v41 = vsub.s32 %v230_v37, %v2414_v2 }
  0x1c   :  { %2165 = vmatprep.subr.bf16.mxu0 %v2372_v1 }
  0x1e   :  { %135 = vbcast.lane.b32.xlu0 %v133_v21, 256 }
  0x1f   :  { %2166 = vmatpush3.bf16.msra.mxu0 %v2439_v30 }
  0x20   :  { %2171 = vmatprep.subr.bf16.mxu0 %v2372_v1 }
  0x21   :  { %2140 = vmatmul.mubr.msk.bf16.gmra.mrb[4].mxu0 %vm43_vm0, %v39_v23  ;;  %vm1013_vm0 = vcmask 259074  }
  0x22   :  { %2167 = vmatprep.mubr.msk.bf16.mxu0 %vm2373_vm1, %v2372_v1 }
  0x29   :  { %2168 = vmatmul.mubr.bf16.vlgmr.msra.gmra.mrb[8].mxu0 %v2374_v29  ;;  %v2376_v29 = vmov 1983009808  }
  0x2a   :  { %2172 = vmatpush3.bf16.msra.mxu0 %v2436_v27  ;;  %2175 = vmatprep.mubr.msk.bf16.mxu0 %vm2373_vm1, %v2372_v1 }
  0x2b   :  { %2173 = vmatprep.subr.bf16.mxu0 %v2372_v1 }
  0x2e   :  { %2174 = vmatpush3.bf16.msra.mxu0 %v2439_v30 }
  0x2f   :  { %2179 = vmatprep.subr.bf16.mxu0 %v2372_v1 }
  0x8c   :  { %v129_v31 = vpop.permute.xlu0 %128  ;;  %v143_v35 = vpop.permute.xlu1 %142 }
  0x8d   :  { %vm179_vm2 = vcmp.eq.s32.totalorder %v2450_v32, %v129_v31  ;;  %vm181_vm3 = vcmp.eq.s32.totalorder %v2450_v32, %v143_v35  ;;  %v415_v31 = vunpack.c.l.s4 %v2376_v29  ;;  %v2053_v35 = vld [vmem:[#allocation4 + $0xa8] ss:$0 sm:$0xff] }
  0x8e   :  { %v2045_v38 = vsel %vm179_vm2, 1.0, %v2372_v1  ;;  %v2047_v39 = vsel %vm181_vm3, 1.0, %v2372_v1  ;;  %vm2019_vm2 = vcmask 257024   ;;  %vm1665_vm3 = vcmask 254976  }
  0x8f   :  { %v203_v42 = vpack.c.bf16 %v2045_v38, %v2045_v38  ;;  %v205_v43 = vpack.c.bf16 %v2047_v39, %v2047_v39  ;;  %v416_v33 = vunpack.c.0.s8 %v415_v31 }
  0x90   :  { %v136_v36 = vpop.permute.xlu0 %135 }
  0x91   :  { %vm180_vm4 = vcmp.eq.s32.totalorder %v2450_v32, %v136_v36  ;;  %v234_v45 = vrot.slane %v203_v42, %v2459_v41  ;;  %v280_v46 = vrot.slane %v205_v43, %v2459_v41  ;;  %v2492_v34 = vsub.s32 %v416_v33, %v2414_v2 }
  0x92   :  { %v2046_v40 = vsel %vm180_vm4, 1.0, %v2372_v1  ;;  %v413_v36 = vcombine.high %v2053_v35, %v2053_v35 }
  0x93   :  { %v204_v44 = vpack.c.bf16 %v2046_v40, %v2046_v40  ;;  %v235_v48 = vcombine.high %v234_v45, %v234_v45  ;;  %v242_v49 = vrot.slane %v234_v45, %v2459_v41  ;;  %v281_v50 = vcombine.high %v280_v46, %v280_v46 }
  0x94   :  { %v2468_v54 = vrot.slane %v280_v46, %v2459_v41  ;;  %v420_v37 = vrot.slane %v2053_v35, %v2492_v34  ;;  %v427_v38 = vrot.slane %v413_v36, %v2492_v34 }
  0x95   :  { %v257_v47 = vrot.slane %v204_v44, %v2459_v41  ;;  %v249_v53 = vrot.slane %v235_v48, %v2459_v41  ;;  %v250_v55 = vcombine.high %v242_v49, %v242_v49  ;;  %v295_v56 = vrot.slane %v281_v50, %v2459_v41 }
  0x96   :  { %v428_v39 = vcombine.high %v420_v37, %v420_v37  ;;  %v577_v42 = vcombine.low %v427_v38, %v420_v37 }
  0x97   :  { %v258_v51 = vcombine.high %v257_v47, %v257_v47  ;;  %v265_v52 = vrot.slane %v257_v47, %v2459_v41  ;;  %v429_v61 = vcombine.low %v242_v49, %v249_v53  ;;  %v432_v63 = vcombine.low %v2468_v54, %v295_v56 }
  0x98   :  { %v576_v40 = vcombine.low %v420_v37, %v428_v39  ;;  %v593_v43 = vcombine.low %v428_v39, %v427_v38  ;;  %v2498_v45 = vrot.slane %v577_v42, %v2492_v34 }
  0x99   :  { %v272_v57 = vrot.slane %v258_v51, %v2459_v41  ;;  %v273_v58 = vcombine.high %v265_v52, %v265_v52  ;;  %v430_v0 = vcombine.low %v250_v55, %v265_v52  ;;  %v439_v7 = vrot.slane %v429_v61, %v2459_v41 }
  0x9a   :  { %v460_v8 = vrot.slane %v432_v63, %v2459_v41  ;;  %v584_v44 = vrot.slane %v576_v40, %v2492_v34  ;;  %v2501_v46 = vrot.slane %v593_v43, %v2492_v34 }
  0x9b   :  { %v431_v3 = vcombine.low %v272_v57, %v273_v58  ;;  %v446_v9 = vrot.slane %v430_v0, %v2459_v41 }
  0x9c   :  { %v2504_v47 = vcombine.low %v584_v44, %v2498_v45  ;;  %v2507_v48 = vcombine.low %v2501_v46, %v584_v44 }
  0x9d   :  { %v453_v10 = vrot.slane %v431_v3, %v2459_v41  ;;  %v461_v15 = vcombine.low %v439_v7, %v446_v9 }
  0x9f   :  { %v462_v16 = vcombine.low %v453_v10, %v460_v8  ;;  %v469_v20 = vrot.slane %v461_v15, %v2459_v41 }
  0xa1   :  { %v476_v21 = vrot.slane %v462_v16, %v2459_v41 }
  0xa3   :  { %v477_v23 = vcombine.low %v469_v20, %v476_v21 }
  0xec   :  { %v2137_v59 = vpop.f32.mrb[0].mxu0 }
  0xed   :  { %v90_v60 = vpop.f32.mrb[1].mxu0 }
  0xee   :  { %v2138_v62 = vpop.f32.mrb[2].mxu0 }
  0xef   :  { %v212_v4 = vpack.c.bf16 %v2138_v62, %v2137_v59  ;;  %v93_v5 = vpop.f32.mrb[3].mxu0 }
  0xf0   :  { %v211_v6 = vpack.c.bf16 %v93_v5, %v90_v60 }
  0xf2   :  { %2144 = vmatpush3.bf16.msra.mxu1 %v211_v6 }
  0xf3   :  { %2145 = vmatprep.subr.bf16.mxu1 %v2372_v1 }
  0xf4   :  { %v2141_v11 = vpop.f32.mrb[4].mxu0 }
  0xf5   :  { %v106_v12 = vpop.f32.mrb[5].mxu0  ;;  %v214_v19 = vpack.c.bf16 %v2141_v11, %v2141_v11 }
  0xf6   :  { %v2142_v13 = vpop.f32.mrb[6].mxu0  ;;  %2146 = vmatpush3.bf16.msra.mxu1 %v212_v4 }
  0xf7   :  { %v109_v14 = vpop.f32.mrb[7].mxu0  ;;  %2147 = vmatprep.subr.bf16.mxu1 %v2372_v1  ;;  %v618_v22 = vsel %vm616_vm5, %v214_v19, 0 }
  0xf8   :  { %v213_v18 = vpack.c.bf16 %v109_v14, %v106_v12  ;;  %v2060_v14 = vld [vmem:[%s2869_s1 + $0x2] sm:$0x3] }
  0xfa   :  { %2148 = vmatpush3.bf16.msra.mxu1 %v213_v18 }
  0xfb   :  { %2149 = vmatprep.subr.bf16.mxu1 %v2372_v1 }
  0xfc   :  { %v977_v24 = vpop.f32.mrb[8].mxu0 }
  0xfd   :  { %v2169_v25 = vpop.f32.mrb[9].mxu0 }
  0xfe   :  { %2150 = vmatpush3.bf16.msra.mxu1 %v618_v22  ;;  %v980_v26 = vpop.f32.mrb[10].mxu0 }
  0xff   :  { %2187 = vmatprep.subr.bf16.mxu1 %v2372_v1  ;;  %v2170_v28 = vpop.f32.mrb[11].mxu0 }
 0x101   :  { %2152 = vmatmul.mubr.msk.bf16.vlgmr.msra.gmra.mrb[0].mxu1 %vm606_vm6, %v477_v23 }
 0x102   :  { %2155 = vmatprep.mubr.msk.bf16.mxu1 %vm2373_vm1, %v2372_v1  ;;  %2188 = vmatpush3.bf16.msra.mxu1 %v2436_v27 }
 0x103   :  { %2189 = vmatprep.subr.bf16.mxu1 %v2372_v1 }
 0x106   :  { %2190 = vmatpush3.bf16.msra.mxu1 %v2439_v30 }
 0x107   :  { %2203 = vmatprep.subr.bf16.mxu1 %v2372_v1 }
 0x1d4   :  { %v654_v49 = vpop.f32.mrb[0].mxu1 }
 0x1d5   :  { %v655_v50 = vadd.f32 %v654_v49, %v2504_v47  ;;  %v2153_v51 = vpop.f32.mrb[1].mxu1 }
 0x1d6   :  { %v657_v52 = vpop.f32.mrb[2].mxu1 }
 0x1d7   :  { %v683_v53 = vcombine.high %v655_v50, %v655_v50  ;;  %v690_v55 = vrot.slane %v655_v50, %v2492_v34  ;;  %v2512_v56 = vadd.f32 %v657_v52, %v2507_v48  ;;  %v2154_v57 = vpop.f32.mrb[3].mxu1  ;;  %v146_v50 = vsub.s32 3, %v2414_v2 }
 0x1d9   :  { %v697_v58 = vrot.slane %v683_v53, %v2492_v34  ;;  %v698_v59 = vcombine.high %v690_v55, %v690_v55  ;;  %v707_v60 = vrot.slane %v2512_v56, %v2492_v34  ;;  %v147_v53 = vrot.slane %v2422_v17, %v146_v50 }
 0x1db   :  { %v785_v61 = vcombine.low %v690_v55, %v698_v59  ;;  %v699_v62 = vcombine.high %v697_v58, %v697_v58  ;;  %v715_v63 = vcombine.high %v707_v60, %v707_v60  ;;  %v799_v3 = vrot.slane %v697_v58, %v2492_v34 }
 0x1dc   :  { %v160_v55 = vsub.s32 5, %v2414_v2 }
 0x1dd   :  { %v792_v0 = vrot.slane %v785_v61, %v2492_v34  ;;  %v801_v4 = vcombine.low %v699_v62, %v707_v60  ;;  %v815_v7 = vrot.slane %v715_v63, %v2492_v34  ;;  %v153_v61 = vsub.s32 4, %v2414_v2 }
 0x1de   :  { %v161_v57 = vrot.slane %v2422_v17, %v160_v55 }
 0x1df   :  { %v800_v5 = vcombine.low %v792_v0, %v799_v3  ;;  %v808_v6 = vrot.slane %v801_v4, %v2492_v34  ;;  %v154_v63 = vrot.slane %v2422_v17, %v153_v61 }
 0x1e1   :  { %921 = vst [vmem:[#allocation2] sm:$0x3f] %v800_v5  ;;  %v816_v8 = vcombine.low %v808_v6, %v815_v7 }
 0x1e3   :  { %922 = vst [vmem:[#allocation2 + $0x8] sm:$0x3f] %v816_v8 }
 0x1e8   :  { %v938_v9 = vld [vmem:[#allocation2] sm:$0x3f] }
 0x1e9   :  { %v983_v10 = vadd.f32 %v977_v24, %v938_v9 }
 0x1ea   :  { %v1025_v31 = vld [vmem:[#allocation2 + $0x8] sm:$0x3f] }
 0x1eb   :  { %v2057_v11 = vmul.f32 -1.442695, %v983_v10 }
 0x1ed   :  { %2257 = vpow2.f32 %v2057_v11 }
 0x1ee   :  { %2259 = vtanh.f32 %v983_v10 }
 0x1f7   :  { %v2258_v12 = vpop.eup %2257 }
 0x1f8   :  { %v988_v13 = vadd.f32 1.0, %v2258_v12  ;;  %v2260_v15 = vpop.eup %2259 }
 0x1fa   :  { %2261 = vrcp.f32 %v988_v13 }
 0x204   :  { %v2262_v16 = vpop.eup %2261 }
 0x205   :  { %v991_v18 = vsel %vm2523_vm9, %v2260_v15, %v2262_v16 }
 0x206   :  { %994 = vrot.lane.b32.xlu1 %v991_v18, %s2377_s0  ;;  %v992_v21 = vmul.f32 0.0, %v991_v18 }
 0x278   :  { %v995_v19 = vpop.permute.xlu1 %994 }
 0x279   :  { %v997_v20 = vmul.f32 %v995_v19, %v991_v18 }
 0x27b   :  { %999 = vrot.lane.b32.xlu0 %v997_v20, %s2378_s27 }
 0x2ed   :  { %v1000_v22 = vpop.permute.xlu0 %999 }
 0x2ee   :  { %v1002_v23 = vadd.f32 %v1000_v22, %v992_v21  ;;  %v296_v22 = vcombine.high %v2468_v54, %v2468_v54 }
 0x2f0   :  { %2263 = vtanh.f32 %v1002_v23 }
 0x2fa   :  { %v2264_v24 = vpop.eup %2263 }
 0x2fb   :  { %1005 = vrot.lane.b32.xlu1 %v2264_v24, %s2377_s0 }
 0x36d   :  { %v1006_v25 = vpop.permute.xlu1 %1005 }
 0x36e   :  { %v2532_v26 = vmul.f32 %v1006_v25, %v991_v18 }
 0x370   :  { %v1026_v28 = vpack.c.bf16 %v2532_v26, %v2532_v26 }
 0x372   :  { %1028 = vrot.lane.b32.xlu0 %v1026_v28, %s2378_s27 }
 0x3e4   :  { %v1029_v29 = vpop.permute.xlu0 %1028 }
 0x3e5   :  { %2176 = vmatmul.mubr.msk.bf16.vlgmr.msra.gmra.mrb[12].mxu0 %vm939_vm10, %v1029_v29 }
 0x3e6   :  { %2180 = vmatpush3.bf16.msra.mxu0 %v2436_v27  ;;  %2183 = vmatprep.mubr.msk.bf16.mxu0 %vm2373_vm1, %v2372_v1 }
 0x3e7   :  { %2181 = vmatprep.subr.bf16.mxu0 %v2372_v1 }
 0x3ea   :  { %2182 = vmatpush3.bf16.msra.mxu0 %v2439_v30 }
 0x3eb   :  { %2195 = vmatprep.subr.bf16.mxu0 %v2372_v1 }
 0x4b8   :  { %v1067_v33 = vpop.f32.mrb[12].mxu0 }
 0x4b9   :  { %v1073_v35 = vadd.f32 %v1067_v33, %v1025_v31  ;;  %v2177_v36 = vpop.f32.mrb[13].mxu0 }
 0x4ba   :  { %v1070_v37 = vpop.f32.mrb[14].mxu0 }
 0x4bb   :  { %v2059_v38 = vmul.f32 -1.442695, %v1073_v35  ;;  %v2178_v39 = vpop.f32.mrb[15].mxu0 }
 0x4bd   :  { %2265 = vpow2.f32 %v2059_v38 }
 0x4be   :  { %2267 = vtanh.f32 %v1073_v35 }
 0x4c7   :  { %v2266_v40 = vpop.eup %2265 }
 0x4c8   :  { %v1078_v42 = vadd.f32 1.0, %v2266_v40  ;;  %v2268_v43 = vpop.eup %2267 }
 0x4ca   :  { %2269 = vrcp.f32 %v1078_v42 }
 0x4d4   :  { %v2270_v44 = vpop.eup %2269 }
 0x4d5   :  { %v1081_v49 = vsel %vm2523_vm9, %v2268_v43, %v2270_v44 }
 0x4d6   :  { %1084 = vrot.lane.b32.xlu1 %v1081_v49, %s2377_s0  ;;  %v1082_v58 = vmul.f32 %v1081_v49, %v1002_v23 }
 0x548   :  { %v1085_v51 = vpop.permute.xlu1 %1084 }
 0x549   :  { %v1087_v52 = vmul.f32 %v1085_v51, %v1081_v49 }
 0x54b   :  { %1089 = vrot.lane.b32.xlu0 %v1087_v52, %s2378_s27  ;;  %v700_v52 = vcombine.high %v2512_v56, %v2512_v56 }
 0x54f   :  { %149 = vbcast.lane.b32.xlu0 %v147_v53, 256  ;;  %v714_v53 = vrot.slane %v700_v52, %v2492_v34 }
 0x551   :  { %v716_v55 = vcombine.high %v714_v53, %v714_v53 }
 0x553   :  { %163 = vbcast.lane.b32.xlu0 %v161_v57, 256  ;;  %v2606_v57 = vcombine.low %v2498_v45, %v2501_v46 }
 0x5bd   :  { %v1090_v59 = vpop.permute.xlu0 %1089 }
 0x5be   :  { %v2552_v60 = vadd.f32 %v1090_v59, %v1082_v58  ;;  %v817_v58 = vcombine.low %v714_v53, %v716_v55  ;;  %v174_v53 = vsub.s32 7, %v2414_v2 }
 0x5c0   :  { %2271 = vtanh.f32 %v2552_v60  ;;  %v824_v56 = vrot.slane %v817_v58, %v2492_v34  ;;  %v175_v58 = vrot.slane %v2422_v17, %v174_v53 }
 0x5c1   :  { %v150_v0 = vpop.permute.xlu0 %149 }
 0x5c2   :  { %vm182_vm11 = vcmp.eq.s32.totalorder %v2450_v32, %v150_v0 }
 0x5c3   :  { %v2048_v3 = vsel %vm182_vm11, 1.0, %v2372_v1 }
 0x5c4   :  { %v206_v4 = vpack.c.bf16 %v2048_v3, %v2048_v3 }
 0x5c5   :  { %v164_v5 = vpop.permute.xlu0 %163 }
 0x5c6   :  { %v303_v6 = vrot.slane %v206_v4, %v2459_v41  ;;  %vm184_vm12 = vcmp.eq.s32.totalorder %v2450_v32, %v164_v5 }
 0x5c7   :  { %v2050_v8 = vsel %vm184_vm12, 1.0, %v2372_v1 }
 0x5c8   :  { %v304_v9 = vcombine.high %v303_v6, %v303_v6  ;;  %v311_v10 = vrot.slane %v303_v6, %v2459_v41  ;;  %v208_v13 = vpack.c.bf16 %v2050_v8, %v2050_v8 }
 0x5ca   :  { %v2272_v62 = vpop.eup %2271  ;;  %v318_v16 = vrot.slane %v304_v9, %v2459_v41  ;;  %v319_v18 = vcombine.high %v311_v10, %v311_v10  ;;  %v2573_v21 = vrot.slane %v208_v13, %v2459_v41  ;;  %v478_v25 = vcombine.low %v296_v22, %v311_v10 }
 0x5cb   :  { %1095 = vrot.lane.b32.xlu1 %v2272_v62, %s2377_s0 }
 0x5cc   :  { %v479_v23 = vcombine.low %v318_v16, %v319_v18  ;;  %v2581_v31 = vrot.slane %v2573_v21, %v2459_v41  ;;  %v488_v37 = vrot.slane %v478_v25, %v2459_v41 }
 0x5ce   :  { %v495_v33 = vrot.slane %v479_v23, %v2459_v41 }
 0x5cf   :  { %156 = vbcast.lane.b32.xlu1 %v154_v63, 256 }
 0x5d0   :  { %v510_v42 = vcombine.low %v488_v37, %v495_v33 }
 0x5d2   :  { %v518_v44 = vrot.slane %v510_v42, %v2459_v41  ;;  %v167_v42 = vsub.s32 6, %v2414_v2  ;;  %v350_v2 = vcombine.high %v2573_v21, %v2573_v21 }
 0x63d   :  { %v1096_v7 = vpop.permute.xlu1 %1095 }
 0x63e   :  { %v2564_v11 = vmul.f32 %v1096_v7, %v1081_v49 }
 0x640   :  { %v1117_v12 = vpack.c.bf16 %v2564_v11, %v2564_v11 }
 0x641   :  { %v157_v15 = vpop.permute.xlu1 %156 }
 0x642   :  { %vm183_vm13 = vcmp.eq.s32.totalorder %v2450_v32, %v157_v15  ;;  %1119 = vrot.lane.b32.xlu1 %v1117_v12, %s2378_s27 }
 0x643   :  { %v2049_v19 = vsel %vm183_vm13, 1.0, %v2372_v1 }
 0x644   :  { %v207_v20 = vpack.c.bf16 %v2049_v19, %v2049_v19 }
 0x646   :  { %v326_v24 = vrot.slane %v207_v20, %v2459_v41 }
 0x648   :  { %v327_v28 = vcombine.high %v326_v24, %v326_v24  ;;  %v334_v29 = vrot.slane %v326_v24, %v2459_v41 }
 0x64a   :  { %v341_v35 = vrot.slane %v327_v28, %v2459_v41  ;;  %v342_v36 = vcombine.high %v334_v29, %v334_v29 }
 0x64c   :  { %v480_v38 = vcombine.low %v334_v29, %v341_v35  ;;  %v481_v54 = vcombine.low %v342_v36, %v2581_v31 }
 0x64e   :  { %v502_v39 = vrot.slane %v480_v38, %v2459_v41  ;;  %v509_v40 = vrot.slane %v481_v54, %v2459_v41 }
 0x650   :  { %v511_v43 = vcombine.low %v502_v39, %v509_v40 }
 0x652   :  { %v525_v49 = vrot.slane %v511_v43, %v2459_v41 }
 0x654   :  { %v526_v50 = vcombine.low %v518_v44, %v525_v49  ;;  %v168_v49 = vrot.slane %v2422_v17, %v167_v42 }
 0x656   :  { %2156 = vmatmul.mubr.msk.bf16.gmra.mrb[4].mxu1 %vm606_vm6, %v526_v50 }
 0x657   :  { %2159 = vmatprep.mubr.msk.bf16.mxu1 %vm2373_vm1, %v2372_v1 }
 0x6b4   :  { %v1120_v51 = vpop.permute.xlu1 %1119 }
 0x6b5   :  { %2184 = vmatmul.mubr.msk.bf16.vlgmr.msra.gmra.mrb[16].mxu0 %vm939_vm10, %v1120_v51 }
 0x6b6   :  { %2196 = vmatpush3.bf16.msra.mxu0 %v2436_v27  ;;  %2199 = vmatprep.mubr.msk.bf16.mxu0 %vm2373_vm1, %v2372_v1 }
 0x6b7   :  { %2197 = vmatprep.subr.bf16.mxu0 %v2372_v1 }
 0x6ba   :  { %2198 = vmatpush3.bf16.msra.mxu0 %v2439_v30 }
 0x6bb   :  { %2211 = vmatprep.subr.bf16.mxu0 %v2372_v1 }
 0x729   :  { %v662_v59 = vpop.f32.mrb[4].mxu1 }
 0x72a   :  { %v663_v61 = vadd.f32 %v662_v59, %v2606_v57  ;;  %v2157_v62 = vpop.f32.mrb[5].mxu1 }
 0x72b   :  { %v665_v63 = vpop.f32.mrb[6].mxu1 }
 0x72c   :  { %v717_v0 = vcombine.high %v663_v61, %v663_v61  ;;  %v724_v3 = vrot.slane %v663_v61, %v2492_v34  ;;  %v666_v4 = vadd.f32 %v665_v63, %v2504_v47  ;;  %v2158_v5 = vpop.f32.mrb[7].mxu1 }
 0x72e   :  { %v731_v6 = vrot.slane %v717_v0, %v2492_v34  ;;  %v732_v7 = vcombine.high %v724_v3, %v724_v3  ;;  %v831_v45 = vrot.slane %v724_v3, %v2492_v34  ;;  %v734_v46 = vcombine.high %v666_v4, %v666_v4 }
 0x72f   :  { %v741_v8 = vrot.slane %v666_v4, %v2492_v34 }
 0x730   :  { %v733_v9 = vcombine.high %v731_v6, %v731_v6  ;;  %v832_v10 = vcombine.low %v824_v56, %v831_v45  ;;  %v833_v12 = vcombine.low %v732_v7, %v731_v6  ;;  %v2616_v13 = vrot.slane %v734_v46, %v2492_v34 }
 0x731   :  { %v749_v15 = vcombine.high %v741_v8, %v741_v8  ;;  %v364_v7 = vrot.slane %v350_v2, %v2459_v41  ;;  %v365_v45 = vcombine.high %v2581_v31, %v2581_v31 }
 0x732   :  { %v840_v47 = vrot.slane %v833_v12, %v2492_v34  ;;  %v847_v16 = vrot.slane %v733_v9, %v2492_v34  ;;  %923 = vst [vmem:[#allocation2 + $0x10] sm:$0x3f] %v832_v10  ;;  %v863_v22 = vrot.slane %v2616_v13, %v2492_v34 }
 0x733   :  { %v849_v18 = vcombine.low %v741_v8, %v749_v15  ;;  %v527_v10 = vcombine.low %v364_v7, %v365_v45 }
 0x734   :  { %v848_v19 = vcombine.low %v840_v47, %v847_v16 }
 0x735   :  { %v856_v20 = vrot.slane %v849_v18, %v2492_v34 }
 0x736   :  { %924 = vst [vmem:[#allocation2 + $0x18] sm:$0x3f] %v848_v19  ;;  %v537_v19 = vrot.slane %v527_v10, %v2459_v41 }
 0x737   :  { %v864_v23 = vcombine.low %v856_v20, %v863_v22 }
 0x739   :  { %925 = vst [vmem:[#allocation2 + $0x20] sm:$0x3f] %v864_v23  ;;  %v1116_v24 = vld [vmem:[#allocation2 + $0x10] sm:$0x3f] }
 0x788   :  { %v1158_v25 = vpop.f32.mrb[16].mxu0 }
 0x789   :  { %v1164_v28 = vadd.f32 %v1158_v25, %v1116_v24  ;;  %v2185_v29 = vpop.f32.mrb[17].mxu0 }
 0x78a   :  { %v1161_v33 = vpop.f32.mrb[18].mxu0 }
 0x78b   :  { %v2062_v35 = vmul.f32 -1.442695, %v1164_v28  ;;  %v2186_v36 = vpop.f32.mrb[19].mxu0 }
 0x78d   :  { %2273 = vpow2.f32 %v2062_v35 }
 0x78e   :  { %2275 = vtanh.f32 %v1164_v28 }
 0x797   :  { %v2274_v37 = vpop.eup %2273 }
 0x798   :  { %v1169_v38 = vadd.f32 1.0, %v2274_v37  ;;  %v2276_v54 = vpop.eup %2275 }
 0x79a   :  { %2277 = vrcp.f32 %v1169_v38  ;;  %v750_v38 = vcombine.high %v2616_v13, %v2616_v13 }
 0x7a4   :  { %v2278_v39 = vpop.eup %2277 }
 0x7a5   :  { %v1172_v40 = vsel %vm2523_vm9, %v2276_v54, %v2278_v39 }
 0x7a6   :  { %1175 = vrot.lane.b32.xlu0 %v1172_v40, %s2377_s0  ;;  %v1173_v50 = vmul.f32 %v1172_v40, %v2552_v60 }
 0x818   :  { %v1176_v43 = vpop.permute.xlu0 %1175 }
 0x819   :  { %v1178_v44 = vmul.f32 %v1176_v43, %v1172_v40 }
 0x81b   :  { %1180 = vrot.lane.b32.xlu1 %v1178_v44, %s2378_s27 }
 0x81f   :  { %170 = vbcast.lane.b32.xlu1 %v168_v49, 256 }
 0x88d   :  { %v1181_v51 = vpop.permute.xlu1 %1180 }
 0x88e   :  { %v2630_v52 = vadd.f32 %v1181_v51, %v1173_v50 }
 0x890   :  { %2279 = vtanh.f32 %v2630_v52 }
 0x891   :  { %v171_v59 = vpop.permute.xlu1 %170 }
 0x892   :  { %vm185_vm14 = vcmp.eq.s32.totalorder %v2450_v32, %v171_v59 }
 0x893   :  { %v2051_v61 = vsel %vm185_vm14, 1.0, %v2372_v1 }
 0x894   :  { %v209_v62 = vpack.c.bf16 %v2051_v61, %v2051_v61 }
 0x896   :  { %v372_v60 = vrot.slane %v209_v62, %v2459_v41 }
 0x898   :  { %v373_v0 = vcombine.high %v372_v60, %v372_v60  ;;  %v380_v5 = vrot.slane %v372_v60, %v2459_v41 }
 0x89a   :  { %v2280_v55 = vpop.eup %2279  ;;  %v387_v56 = vrot.slane %v373_v0, %v2459_v41  ;;  %v388_v46 = vcombine.high %v380_v5, %v380_v5 }
 0x89b   :  { %1186 = vrot.lane.b32.xlu0 %v2280_v55, %s2377_s0 }
 0x89c   :  { %v528_v8 = vcombine.low %v380_v5, %v387_v56  ;;  %v1207_v5 = vld [vmem:[#allocation2 + $0x18] sm:$0x3f] }
 0x89f   :  { %177 = vbcast.lane.b32.xlu0 %v175_v58, 256 }
 0x90d   :  { %v1187_v63 = vpop.permute.xlu0 %1186 }
 0x90e   :  { %v2639_v3 = vmul.f32 %v1187_v63, %v1172_v40 }
 0x910   :  { %v1208_v4 = vpack.c.bf16 %v2639_v3, %v2639_v3 }
 0x911   :  { %v178_v17 = vpop.permute.xlu0 %177 }
 0x912   :  { %vm186_vm15 = vcmp.eq.s32.totalorder %v2450_v32, %v178_v17  ;;  %1210 = vrot.lane.b32.xlu1 %v1208_v4, %s2378_s27  ;;  %v544_v32 = vrot.slane %v528_v8, %v2459_v41 }
 0x913   :  { %v2052_v6 = vsel %vm186_vm15, 1.0, %v2372_v1 }
 0x914   :  { %v210_v21 = vpack.c.bf16 %v2052_v6, %v2052_v6  ;;  %v559_v23 = vcombine.low %v537_v19, %v544_v32 }
 0x916   :  { %v395_v9 = vrot.slane %v210_v21, %v2459_v41  ;;  %v567_v25 = vrot.slane %v559_v23, %v2459_v41 }
 0x918   :  { %v396_v12 = vcombine.high %v395_v9, %v395_v9  ;;  %v403_v15 = vrot.slane %v395_v9, %v2459_v41 }
 0x91a   :  { %v410_v47 = vrot.slane %v396_v12, %v2459_v41  ;;  %v411_v16 = vcombine.high %v403_v15, %v403_v15  ;;  %v529_v18 = vcombine.low %v388_v46, %v403_v15 }
 0x91c   :  { %v530_v20 = vcombine.low %v410_v47, %v411_v16  ;;  %v551_v31 = vrot.slane %v529_v18, %v2459_v41 }
 0x91e   :  { %v558_v22 = vrot.slane %v530_v20, %v2459_v41 }
 0x920   :  { %v560_v24 = vcombine.low %v551_v31, %v558_v22 }
 0x922   :  { %v574_v28 = vrot.slane %v560_v24, %v2459_v41 }
 0x924   :  { %v575_v29 = vcombine.low %v567_v25, %v574_v28 }
 0x926   :  { %2160 = vmatmul.mubr.msk.bf16.gmra.mrb[8].mxu1 %vm606_vm6, %v575_v29 }
 0x927   :  { %2191 = vmatprep.mubr.msk.bf16.mxu1 %vm2373_vm1, %v2372_v1 }
 0x984   :  { %v1211_v33 = vpop.permute.xlu1 %1210 }
 0x985   :  { %2192 = vmatmul.mubr.msk.bf16.vlgmr.msra.gmra.mrb[12].mxu1 %vm939_vm10, %v1211_v33 }
 0x986   :  { %2204 = vmatpush3.bf16.msra.mxu1 %v2436_v27  ;;  %2207 = vmatprep.mubr.msk.bf16.mxu1 %vm2373_vm1, %v2372_v1 }
 0x987   :  { %2205 = vmatprep.subr.bf16.mxu1 %v2372_v1 }
 0x98a   :  { %2206 = vmatpush3.bf16.msra.mxu1 %v2439_v30 }
 0x98b   :  { %2219 = vmatprep.subr.bf16.mxu1 %v2372_v1 }
 0x9f9   :  { %v670_v41 = vpop.f32.mrb[8].mxu1 }
 0x9fa   :  { %v671_v35 = vadd.f32 %v670_v41, %v2507_v48  ;;  %v2161_v36 = vpop.f32.mrb[9].mxu1 }
 0x9fb   :  { %v673_v37 = vpop.f32.mrb[10].mxu1 }
 0x9fc   :  { %v751_v54 = vcombine.high %v671_v35, %v671_v35  ;;  %v758_v39 = vrot.slane %v671_v35, %v2492_v34  ;;  %v674_v40 = vadd.f32 %v673_v37, %v2606_v57  ;;  %v2162_v42 = vpop.f32.mrb[11].mxu1 }
 0x9fe   :  { %v765_v43 = vrot.slane %v751_v54, %v2492_v34  ;;  %v766_v44 = vcombine.high %v758_v39, %v758_v39  ;;  %v865_v49 = vcombine.low %v750_v38, %v758_v39  ;;  %v768_v50 = vcombine.high %v674_v40, %v674_v40 }
 0x9ff   :  { %v775_v51 = vrot.slane %v674_v40, %v2492_v34 }
 0xa00   :  { %v767_v53 = vcombine.high %v765_v43, %v765_v43  ;;  %v872_v48 = vrot.slane %v865_v49, %v2492_v34  ;;  %v879_v55 = vrot.slane %v766_v44, %v2492_v34  ;;  %v782_v13 = vrot.slane %v768_v50, %v2492_v34 }
 0xa01   :  { %v783_v58 = vcombine.high %v775_v51, %v775_v51  ;;  %v895_v63 = vrot.slane %v775_v51, %v2492_v34 }
 0xa02   :  { %v880_v59 = vcombine.low %v872_v48, %v879_v55  ;;  %v881_v61 = vcombine.low %v765_v43, %v767_v53  ;;  %v784_v62 = vcombine.high %v782_v13, %v782_v13 }
 0xa03   :  { %v897_v57 = vcombine.low %v783_v58, %v782_v13 }
 0xa04   :  { %926 = vst [vmem:[#allocation2 + $0x28] sm:$0x3f] %v880_v59  ;;  %v888_v60 = vrot.slane %v881_v61, %v2492_v34  ;;  %v911_v0 = vrot.slane %v784_v62, %v2492_v34 }
 0xa05   :  { %v904_v2 = vrot.slane %v897_v57, %v2492_v34 }
 0xa06   :  { %v896_v4 = vcombine.low %v888_v60, %v895_v63 }
 0xa07   :  { %v912_v17 = vcombine.low %v904_v2, %v911_v0 }
 0xa08   :  { %927 = vst [vmem:[#allocation2 + $0x30] sm:$0x3f] %v896_v4 }
 0xa09   :  { %928 = vst [vmem:[#allocation2 + $0x38] sm:$0x3f] %v912_v17 }
 0xa0b   :  { %v1389_v13 = vld [vmem:[#allocation2 + $0x28] sm:$0x3f] }
 0xa58   :  { %v1249_v56 = vpop.f32.mrb[12].mxu1 }
 0xa59   :  { %v1255_v6 = vadd.f32 %v1249_v56, %v1207_v5  ;;  %v2193_v7 = vpop.f32.mrb[13].mxu1 }
 0xa5a   :  { %v1252_v45 = vpop.f32.mrb[14].mxu1 }
 0xa5b   :  { %v2065_v21 = vmul.f32 -1.442695, %v1255_v6  ;;  %v2194_v46 = vpop.f32.mrb[15].mxu1 }
 0xa5d   :  { %2281 = vpow2.f32 %v2065_v21 }
 0xa5e   :  { %2283 = vtanh.f32 %v1255_v6 }
 0xa67   :  { %v2282_v8 = vpop.eup %2281 }
 0xa68   :  { %v1260_v9 = vadd.f32 1.0, %v2282_v8  ;;  %v2284_v10 = vpop.eup %2283 }
 0xa6a   :  { %2285 = vrcp.f32 %v1260_v9  ;;  %v1480_v9 = vld [vmem:[#allocation2 + $0x30] sm:$0x3f] }
 0xa74   :  { %v2286_v12 = vpop.eup %2285 }
 0xa75   :  { %v1263_v15 = vsel %vm2523_vm9, %v2284_v10, %v2286_v12 }
 0xa76   :  { %1266 = vrot.lane.b32.xlu0 %v1263_v15, %s2377_s0  ;;  %v1264_v16 = vmul.f32 %v1263_v15, %v2630_v52  ;;  %v1298_v52 = vld [vmem:[#allocation2 + $0x20] sm:$0x3f] }
 0xae8   :  { %v1267_v32 = vpop.permute.xlu0 %1266 }
 0xae9   :  { %v1269_v47 = vmul.f32 %v1267_v32, %v1263_v15 }
 0xaeb   :  { %1271 = vrot.lane.b32.xlu1 %v1269_v47, %s2378_s27 }
 0xb5d   :  { %v1272_v18 = vpop.permute.xlu1 %1271 }
 0xb5e   :  { %v1274_v19 = vadd.f32 %v1272_v18, %v1264_v16 }
 0xb60   :  { %2287 = vtanh.f32 %v1274_v19 }
 0xb6a   :  { %v2288_v20 = vpop.eup %2287 }
 0xb6b   :  { %1277 = vrot.lane.b32.xlu0 %v2288_v20, %s2377_s0 }
 0xbdd   :  { %v1278_v31 = vpop.permute.xlu0 %1277 }
 0xbde   :  { %v2692_v22 = vmul.f32 %v1278_v31, %v1263_v15 }
 0xbe0   :  { %v1299_v23 = vpack.c.bf16 %v2692_v22, %v2692_v22 }
 0xbe2   :  { %1301 = vrot.lane.b32.xlu1 %v1299_v23, %s2378_s27 }
 0xc54   :  { %v1302_v24 = vpop.permute.xlu1 %1301 }
 0xc55   :  { %2200 = vmatmul.mubr.msk.bf16.vlgmr.msra.gmra.mrb[20].mxu0 %vm939_vm10, %v1302_v24 }
 0xc56   :  { %2212 = vmatpush3.bf16.msra.mxu0 %v2436_v27  ;;  %2215 = vmatprep.mubr.msk.bf16.mxu0 %vm2373_vm1, %v2372_v1 }
 0xc57   :  { %2213 = vmatprep.subr.bf16.mxu0 %v2372_v1 }
 0xc5a   :  { %2214 = vmatpush3.bf16.msra.mxu0 %v2439_v30 }
 0xc5b   :  { %2227 = vmatprep.subr.bf16.mxu0 %v2372_v1 }
 0xd28   :  { %v1340_v25 = vpop.f32.mrb[20].mxu0 }
 0xd29   :  { %v1346_v28 = vadd.f32 %v1340_v25, %v1298_v52  ;;  %v2201_v29 = vpop.f32.mrb[21].mxu0 }
 0xd2a   :  { %v1343_v33 = vpop.f32.mrb[22].mxu0 }
 0xd2b   :  { %v2068_v41 = vmul.f32 -1.442695, %v1346_v28  ;;  %v2202_v35 = vpop.f32.mrb[23].mxu0 }
 0xd2d   :  { %2289 = vpow2.f32 %v2068_v41 }
 0xd2e   :  { %2291 = vtanh.f32 %v1346_v28 }
 0xd37   :  { %v2290_v36 = vpop.eup %2289 }
 0xd38   :  { %v1351_v37 = vadd.f32 1.0, %v2290_v36  ;;  %v2292_v38 = vpop.eup %2291 }
 0xd3a   :  { %2293 = vrcp.f32 %v1351_v37 }
 0xd44   :  { %v2294_v54 = vpop.eup %2293 }
 0xd45   :  { %v1354_v39 = vsel %vm2523_vm9, %v2292_v38, %v2294_v54  ;;  %v1571_v38 = vld [vmem:[#allocation2 + $0x38] sm:$0x3f] }
 0xd46   :  { %1357 = vrot.lane.b32.xlu0 %v1354_v39, %s2377_s0  ;;  %v1355_v43 = vmul.f32 %v1354_v39, %v1274_v19 }
 0xdb8   :  { %v1358_v40 = vpop.permute.xlu0 %1357 }
 0xdb9   :  { %v1360_v42 = vmul.f32 %v1358_v40, %v1354_v39 }
 0xdbb   :  { %1362 = vrot.lane.b32.xlu1 %v1360_v42, %s2378_s27 }
 0xe2d   :  { %v1363_v44 = vpop.permute.xlu1 %1362 }
 0xe2e   :  { %v1365_v49 = vadd.f32 %v1363_v44, %v1355_v43 }
 0xe30   :  { %2295 = vtanh.f32 %v1365_v49 }
 0xe3a   :  { %v2296_v50 = vpop.eup %2295 }
 0xe3b   :  { %1368 = vrot.lane.b32.xlu0 %v2296_v50, %s2377_s0 }
 0xead   :  { %v1369_v51 = vpop.permute.xlu0 %1368 }
 0xeae   :  { %v2709_v53 = vmul.f32 %v1369_v51, %v1354_v39 }
 0xeb0   :  { %v1390_v48 = vpack.c.bf16 %v2709_v53, %v2709_v53 }
 0xeb2   :  { %1392 = vrot.lane.b32.xlu1 %v1390_v48, %s2378_s27 }
 0xf24   :  { %v1393_v55 = vpop.permute.xlu1 %1392 }
 0xf25   :  { %2208 = vmatmul.mubr.msk.bf16.vlgmr.msra.gmra.mrb[16].mxu1 %vm939_vm10, %v1393_v55 }
 0xf26   :  { %2220 = vmatpush3.bf16.msra.mxu1 %v2436_v27  ;;  %2223 = vmatprep.mubr.msk.bf16.mxu1 %vm2373_vm1, %v2372_v1 }
 0xf27   :  { %2221 = vmatprep.subr.bf16.mxu1 %v2372_v1 }
 0xf2a   :  { %2222 = vmatpush3.bf16.msra.mxu1 %v2439_v30 }
 0xff8   :  { %v1431_v58 = vpop.f32.mrb[16].mxu1 }
 0xff9   :  { %v1437_v59 = vadd.f32 %v1431_v58, %v1389_v13  ;;  %v2209_v61 = vpop.f32.mrb[17].mxu1  ;;  %v1015_v13 = vld [vmem:[%s2869_s1] sm:$0x3]  ;;  %v2066_v58 = vld [vmem:[%s2869_s1 + $0x6] sm:$0x3] }
 0xffa   :  { %v1434_v62 = vpop.f32.mrb[18].mxu1 }
 0xffb   :  { %v2071_v57 = vmul.f32 -1.442695, %v1437_v59  ;;  %v2210_v60 = vpop.f32.mrb[19].mxu1  ;;  %v2063_v62 = vld [vmem:[%s2869_s1 + $0x4] sm:$0x3] }
 0xffc   :  { %v2072_v60 = vld [vmem:[%s2869_s1 + $0xa] sm:$0x3] }
 0xffd   :  { %2297 = vpow2.f32 %v2071_v57  ;;  %v2069_v57 = vld [vmem:[%s2869_s1 + $0x8] sm:$0x3] }
 0xffe   :  { %2299 = vtanh.f32 %v1437_v59 }
0x1007   :  { %v2298_v63 = vpop.eup %2297 }
0x1008   :  { %v1442_v0 = vadd.f32 1.0, %v2298_v63  ;;  %v2300_v27 = vpop.eup %2299  ;;  %v2078_v63 = vld [vmem:[%s2869_s1 + $0xe] sm:$0x3] }
0x100a   :  { %2301 = vrcp.f32 %v1442_v0 }
0x1014   :  { %v2302_v2 = vpop.eup %2301 }
0x1015   :  { %v1445_v4 = vsel %vm2523_vm9, %v2300_v27, %v2302_v2 }
0x1016   :  { %1448 = vrot.lane.b32.xlu0 %v1445_v4, %s2377_s0  ;;  %v1446_v5 = vmul.f32 %v1445_v4, %v1365_v49 }
0x1088   :  { %v1449_v30 = vpop.permute.xlu0 %1448 }
0x1089   :  { %v1451_v17 = vmul.f32 %v1449_v30, %v1445_v4 }
0x108b   :  { %1453 = vrot.lane.b32.xlu1 %v1451_v17, %s2378_s27  ;;  %v2075_v17 = vld [vmem:[%s2869_s1 + $0xc] sm:$0x3]  ;;  %s2379_s1 = smov 127  }
0x10fd   :  { %v1454_v56 = vpop.permute.xlu1 %1453 }
0x10fe   :  { %v1456_v6 = vadd.f32 %v1454_v56, %v1446_v5 }
0x1100   :  { %2303 = vtanh.f32 %v1456_v6 }
0x110a   :  { %v2304_v7 = vpop.eup %2303 }
0x110b   :  { %1459 = vrot.lane.b32.xlu0 %v2304_v7, %s2377_s0 }
0x117d   :  { %v1460_v45 = vpop.permute.xlu0 %1459 }
0x117e   :  { %v2725_v21 = vmul.f32 %v1460_v45, %v1445_v4 }
0x1180   :  { %v1481_v46 = vpack.c.bf16 %v2725_v21, %v2725_v21 }
0x1182   :  { %1483 = vrot.lane.b32.xlu1 %v1481_v46, %s2378_s27 }
0x11f4   :  { %v1484_v8 = vpop.permute.xlu1 %1483 }
0x11f5   :  { %2216 = vmatmul.mubr.msk.bf16.vlgmr.msra.gmra.mrb[24].mxu0 %vm939_vm10, %v1484_v8 }
0x11f6   :  { %2231 = vmatprep.mubr.msk.bf16.mxu0 %vm2373_vm1, %v2372_v1  ;;  %vm1736_vm1 = vcmask 1041408  }
0x12c8   :  { %v1522_v10 = vpop.f32.mrb[24].mxu0 }
0x12c9   :  { %v1528_v12 = vadd.f32 %v1522_v10, %v1480_v9  ;;  %v2217_v15 = vpop.f32.mrb[25].mxu0 }
0x12ca   :  { %v1525_v32 = vpop.f32.mrb[26].mxu0 }
0x12cb   :  { %v2074_v47 = vmul.f32 -1.442695, %v1528_v12  ;;  %v2218_v16 = vpop.f32.mrb[27].mxu0 }
0x12cd   :  { %2305 = vpow2.f32 %v2074_v47 }
0x12ce   :  { %2307 = vtanh.f32 %v1528_v12 }
0x12d7   :  { %v2306_v18 = vpop.eup %2305 }
0x12d8   :  { %v1533_v19 = vadd.f32 1.0, %v2306_v18  ;;  %v2308_v20 = vpop.eup %2307 }
0x12da   :  { %2309 = vrcp.f32 %v1533_v19 }
0x12e4   :  { %v2310_v31 = vpop.eup %2309 }
0x12e5   :  { %v1536_v23 = vsel %vm2523_vm9, %v2308_v20, %v2310_v31  ;;  %v1746_v31 = vld [vmem:[#allocation4 + $0x68] sm:$0xff] }
0x12e6   :  { %1539 = vrot.lane.b32.xlu0 %v1536_v23, %s2377_s0  ;;  %v1537_v25 = vmul.f32 %v1536_v23, %v1456_v6 }
0x1358   :  { %v1540_v24 = vpop.permute.xlu0 %1539 }
0x1359   :  { %v1542_v52 = vmul.f32 %v1540_v24, %v1536_v23 }
0x135b   :  { %1544 = vrot.lane.b32.xlu1 %v1542_v52, %s2378_s27 }
0x13cd   :  { %v1545_v28 = vpop.permute.xlu1 %1544 }
0x13ce   :  { %v1547_v29 = vadd.f32 %v1545_v28, %v1537_v25 }
0x13d0   :  { %2311 = vtanh.f32 %v1547_v29 }
0x13da   :  { %v2312_v33 = vpop.eup %2311 }
0x13db   :  { %1550 = vrot.lane.b32.xlu0 %v2312_v33, %s2377_s0  ;;  %v1677_v33 = vld [vmem:[#allocation4 + $0x90] sm:$0xff] }
0x144d   :  { %v1551_v41 = vpop.permute.xlu0 %1550 }
0x144e   :  { %v2738_v35 = vmul.f32 %v1551_v41, %v1536_v23  ;;  %v1748_v23 = vld [vmem:[#allocation4 + $0x78] sm:$0xff] }
0x144f   :  { %v1678_v41 = vld [vmem:[#allocation4 + $0x98] sm:$0xff] }
0x1450   :  { %v1572_v36 = vpack.c.bf16 %v2738_v35, %v2738_v35 }
0x1452   :  { %1574 = vrot.lane.b32.xlu1 %v1572_v36, %s2378_s27 }
0x14c4   :  { %v1575_v37 = vpop.permute.xlu1 %1574 }
0x14c5   :  { %2224 = vmatmul.mubr.msk.bf16.vlgmr.msra.gmra.mrb[20].mxu1 %vm939_vm10, %v1575_v37  ;;  %v1679_v37 = vld [vmem:[#allocation4 + $0xa0] sm:$0xff] }
0x1598   :  { %v1613_v54 = vpop.f32.mrb[20].mxu1 }
0x1599   :  { %v1619_v39 = vadd.f32 %v1613_v54, %v1571_v38  ;;  %v2225_v40 = vpop.f32.mrb[21].mxu1  ;;  %v1681_v38 = vpack.c.bf16 %v1679_v37, %v1678_v41 }
0x159a   :  { %v1616_v42 = vpop.f32.mrb[22].mxu1 }
0x159b   :  { %v2077_v43 = vmul.f32 -1.442695, %v1619_v39  ;;  %v2226_v44 = vpop.f32.mrb[23].mxu1 }
0x159d   :  { %2313 = vpow2.f32 %v2077_v43 }
0x159e   :  { %2315 = vtanh.f32 %v1619_v39 }
0x15a7   :  { %v2314_v49 = vpop.eup %2313 }
0x15a8   :  { %v1624_v50 = vadd.f32 1.0, %v2314_v49  ;;  %v2316_v51 = vpop.eup %2315 }
0x15aa   :  { %2317 = vrcp.f32 %v1624_v50 }
0x15b4   :  { %v2318_v48 = vpop.eup %2317 }
0x15b5   :  { %v2746_v55 = vsel %vm2523_vm9, %v2316_v51, %v2318_v48 }
0x15b6   :  { %1630 = vrot.lane.b32.xlu0 %v2746_v55, %s2377_s0  ;;  %v1628_v0 = vmul.f32 %v2746_v55, %v1547_v29  ;;  %v1676_v29 = vld [vmem:[#allocation4 + $0x88] sm:$0xff] }
0x15b7   :  { %v1680_v36 = vpack.c.bf16 %v1677_v33, %v1676_v29 }
0x15b9   :  { %2228 = vmatpush3.bf16.msra.mxu0 %v1680_v36 }
0x15ba   :  { %1018 = vperm.xlu0 %2255, %v1015_v13   ;;  %2229 = vmatprep.subr.bf16.mxu0 %v2372_v1 }
0x15bd   :  { %2230 = vmatpush3.bf16.msra.mxu0 %v1681_v38 }
0x15be   :  { %1291 = vperm.xlu0 %2255, %v2066_v58  }
0x1628   :  { %v1631_v59 = vpop.permute.xlu0 %1630 }
0x1629   :  { %v1633_v61 = vmul.f32 %v1631_v59, %v2746_v55 }
0x162b   :  { %1635 = vrot.lane.b32.xlu1 %v1633_v61, %s2378_s27 }
0x162f   :  { %1109 = vperm.xlu1 %2256, %v2060_v14  }
0x1633   :  { %1200 = vperm.xlu1 %2256, %v2063_v62  }
0x1637   :  { %1382 = vperm.xlu1 %2256, %v2069_v57  }
0x1639   :  { %v1019_v30 = vpop.permute.xlu0 %1018 }
0x163a   :  { %v1021_v5 = vmul.f32 %v1019_v30, %v2532_v26 }
0x163b   :  { %1473 = vperm.xlu1 %2256, %v2072_v60  }
0x163c   :  { %v1023_v7 = vmax.f32 %v1021_v5, -1e+30 }
0x163d   :  { %v1292_v45 = vpop.permute.xlu0 %1291 }
0x163e   :  { %v1294_v10 = vmul.f32 %v1292_v45, %v2692_v22  ;;  %v2081_v45 = vld [vmem:[#allocation4 + $0xa9] ss:$0 sm:$0xff] }
0x163f   :  { %1655 = vperm.xlu1 %2256, %v2078_v63  }
0x1643   :  { %1100 = vrot.lane.b32.xlu1 %v2564_v11, %s2378_s27 }
0x1647   :  { %1282 = vrot.lane.b32.xlu1 %v2692_v22, %s2378_s27 }
0x164b   :  { %1464 = vrot.lane.b32.xlu1 %v2725_v21, %s2378_s27 }
0x169d   :  { %v1636_v27 = vpop.permute.xlu1 %1635 }
0x169e   :  { %v1638_v2 = vadd.f32 %v1636_v27, %v1628_v0 }
0x16a0   :  { %2319 = vtanh.f32 %v1638_v2 }
0x16aa   :  { %v2320_v4 = vpop.eup %2319 }
0x16ab   :  { %1641 = vrot.lane.b32.xlu0 %v2320_v4, %s2377_s0 }
0x16ae   :  { %v1110_v56 = vpop.permute.xlu1 %1109 }
0x16af   :  { %v1112_v6 = vmul.f32 %v1110_v56, %v2564_v11  ;;  %1564 = vperm.xlu0 %2255, %v2075_v17  }
0x16b1   :  { %v1114_v8 = vmax.f32 %v1023_v7, %v1112_v6 }
0x16b2   :  { %v1201_v46 = vpop.permute.xlu1 %1200 }
0x16b3   :  { %v1203_v9 = vmul.f32 %v1201_v46, %v2639_v3  ;;  %1010 = vrot.lane.b32.xlu0 %v2532_v26, %s2378_s27 }
0x16b5   :  { %v1205_v12 = vmax.f32 %v1114_v8, %v1203_v9  ;;  %v1800_v9 = vcombine.low %v2081_v45, %v2081_v45 }
0x16b6   :  { %v1383_v15 = vpop.permute.xlu1 %1382 }
0x16b7   :  { %v1296_v32 = vmax.f32 %v1205_v12, %v1294_v10  ;;  %v1385_v47 = vmul.f32 %v1383_v15, %v2709_v53  ;;  %1191 = vrot.lane.b32.xlu0 %v2639_v3, %s2378_s27  ;;  %v2079_v10 = vld [vmem:[#allocation4 + $0xaa] ss:$0 sm:$0xff] }
0x16b9   :  { %v1387_v11 = vmax.f32 %v1296_v32, %v1385_v47 }
0x16ba   :  { %v1474_v16 = vpop.permute.xlu1 %1473 }
0x16bb   :  { %v1476_v18 = vmul.f32 %v1474_v16, %v2725_v21  ;;  %1373 = vrot.lane.b32.xlu0 %v2709_v53, %s2378_s27  ;;  %v1747_v21 = vld [vmem:[#allocation4 + $0x70] sm:$0xff]  ;;  %v1749_v53 = vld [vmem:[#allocation4 + $0x80] sm:$0xff] }
0x16bc   :  { %v1750_v24 = vpack.c.bf16 %v1747_v21, %v1746_v31  ;;  %v1751_v52 = vpack.c.bf16 %v1749_v53, %v1748_v23 }
0x16bd   :  { %v1478_v19 = vmax.f32 %v1387_v11, %v1476_v18 }
0x16be   :  { %v1656_v20 = vpop.permute.xlu1 %1655  ;;  %2235 = vmatprep.subr.bf16.mxu1 %v1750_v24 }
0x16bf   :  { %1555 = vrot.lane.b32.xlu0 %v2738_v35, %s2378_s27  ;;  %2236 = vmatpush3.bf16.msra.mxu1 %v1750_v24 }
0x16c0   :  { %2237 = vmatprep.subr.bf16.mxu1 %v1751_v52 }
0x16c2   :  { %v1101_v26 = vpop.permute.xlu1 %1100 }
0x16c3   :  { %1104 = vst.msk [vmem:[#allocation3 + $0x2] sm:$0x3c] %vm1013_vm0, %v1101_v26  ;;  %2238 = vmatpush3.bf16.msra.mxu1 %v1751_v52 }
0x16c6   :  { %v1283_v22 = vpop.permute.xlu1 %1282 }
0x16c7   :  { %1286 = vst.msk [vmem:[#allocation3 + $0xa] sm:$0x3c] %vm1013_vm0, %v1283_v22 }
0x16ca   :  { %v1465_v3 = vpop.permute.xlu1 %1464 }
0x16cb   :  { %1468 = vst.msk [vmem:[#allocation3 + $0x12] sm:$0x3c] %vm1013_vm0, %v1465_v3 }
0x16ce   :  { %v2821_v58 = vld [vmem:[#allocation3 + $0xc] sm:$0xf] }
0x16d2   :  { %v2832_v63 = vld [vmem:[#allocation3 + $0x14] sm:$0xf] }
0x171d   :  { %v1642_v25 = vpop.permute.xlu0 %1641 }
0x171e   :  { %v1644_v28 = vmul.f32 %v1642_v25, %v2746_v55  ;;  %v2088_v25 = vld [vmem:[#allocation4 + $0xab] ss:$0 sm:$0xff] }
0x1720   :  { %1646 = vrot.lane.b32.xlu1 %v1644_v28, %s2378_s27  ;;  %v1658_v40 = vmul.f32 %v1656_v20, %v1644_v28 }
0x172e   :  { %v1565_v54 = vpop.permute.xlu0 %1564 }
0x172f   :  { %v1567_v39 = vmul.f32 %v1565_v54, %v2738_v35  ;;  %v2815_v35 = vld [vmem:[#allocation3 + $0x4] sm:$0xf] }
0x1731   :  { %v1569_v42 = vmax.f32 %v1478_v19, %v1567_v39 }
0x1732   :  { %v1011_v43 = vpop.permute.xlu0 %1010 }
0x1733   :  { %v2805_v44 = vmax.f32 %v1569_v42, %v1658_v40  ;;  %1014 = vst.msk [vmem:[#allocation3 - $0x2] sm:$0x3c] %vm1013_vm0, %v1011_v43 }
0x1735   :  { %v1675_v49 = vpack.c.bf16 %v2805_v44, %v2805_v44 }
0x1736   :  { %v1192_v50 = vpop.permute.xlu0 %1191 }
0x1737   :  { %1195 = vst.msk [vmem:[#allocation3 + $0x6] sm:$0x3c] %vm1013_vm0, %v1192_v50  ;;  %1688 = vrot.lane.b32.xlu0 %v1675_v49, %s2378_s27 }
0x173a   :  { %v1374_v1 = vpop.permute.xlu0 %1373  ;;  %v2812_v51 = vld [vmem:[#allocation3] sm:$0xf] }
0x173b   :  { %1377 = vst.msk [vmem:[#allocation3 + $0xe] sm:$0x3c] %vm1013_vm0, %v1374_v1  ;;  %v2082_v48 = vpack.c.bf16 %v2815_v35, %v2812_v51 }
0x173d   :  { %v1773_v61 = vrot.slane %v2082_v48, %v2492_v34 }
0x173e   :  { %v1556_v55 = vpop.permute.xlu0 %1555  ;;  %v2819_v13 = vld [vmem:[#allocation3 + $0x8] sm:$0xf] }
0x173f   :  { %1559 = vst.msk [vmem:[#allocation3 + $0x16] sm:$0x3c] %vm1013_vm0, %v1556_v55  ;;  %v2083_v59 = vpack.c.bf16 %v2821_v58, %v2819_v13 }
0x1741   :  { %v1780_v14 = vrot.slane %v2083_v59, %v2492_v34 }
0x1742   :  { %v2830_v60 = vld [vmem:[#allocation3 + $0x10] sm:$0xf] }
0x1743   :  { %v1781_v62 = vcombine.low %v1773_v61, %v1780_v14  ;;  %v2084_v0 = vpack.c.bf16 %v2832_v63, %v2830_v60  ;;  %v2089_v61 = vld [vmem:[#allocation4 + $0xac] ss:$0 sm:$0xff] }
0x1745   :  { %2239 = vmatprep.mubr.msk.bf16.mxu1 %vm939_vm10, %v1781_v62  ;;  %v1790_v30 = vrot.slane %v2084_v0, %v2492_v34 }
0x1746   :  { %v1673_v27 = vld [vmem:[#allocation3 + $0x18] sm:$0xf] }
0x1792   :  { %v1647_v57 = vpop.permute.xlu1 %1646 }
0x1793   :  { %1650 = vst.msk [vmem:[#allocation3 + $0x1a] sm:$0x3c] %vm1013_vm0, %v1647_v57 }
0x179a   :  { %v1674_v2 = vld [vmem:[#allocation3 + $0x1c] sm:$0xf] }
0x179b   :  { %v2085_v4 = vpack.c.bf16 %v1674_v2, %v1673_v27 }
0x179d   :  { %v1797_v17 = vrot.slane %v2085_v4, %v2492_v34 }
0x179f   :  { %v1798_v5 = vcombine.low %v1790_v30, %v1797_v17 }
0x17a1   :  { %2240 = vmatmul.mubr.msk.bf16.vlgmr.msra.gmra.mrb[24].mxu1 %vm939_vm10, %v1798_v5 }
0x17a9   :  { %v1689_v56 = vpop.permute.xlu0 %1688 }
0x17aa   :  { %2232 = vmatmul.mubr.msk.bf16.vlgmr.msra.gmra.mrb[28].mxu0 %vm939_vm10, %v1689_v56 }
0x1874   :  { %v2241_v6 = vpop.f32.mrb[24].mxu1 }
0x1875   :  { %v1842_v7 = vpop.f32.mrb[25].mxu1  ;;  %v1851_v47 = vadd.f32 %v2241_v6, %v1800_v9 }
0x1876   :  { %v2242_v46 = vpop.f32.mrb[26].mxu1  ;;  %v1843_v12 = vadd.f32 %v1842_v7, %v1800_v9 }
0x1877   :  { %v1845_v8 = vpop.f32.mrb[27].mxu1  ;;  %v1863_v22 = vcombine.high %v1851_v47, %v1851_v47 }
0x1878   :  { %v1846_v15 = vadd.f32 %v1845_v8, %v1800_v9  ;;  %v1861_v20 = vcombine.high %v1843_v12, %v1843_v12 }
0x187a   :  { %v1862_v26 = vcombine.high %v1846_v15, %v1846_v15 }
0x187d   :  { %v1727_v32 = vpop.f32.mrb[28].mxu0 }
0x187e   :  { %v1728_v11 = vadd.f32 %v2079_v10, %v1727_v32  ;;  %v2233_v16 = vpop.f32.mrb[29].mxu0 }
0x187f   :  { %v1730_v34 = vpop.f32.mrb[30].mxu0 }
0x1880   :  { %v1734_v18 = vrot.slane %v1728_v11, 6  ;;  %v2234_v19 = vpop.f32.mrb[31].mxu0 }
0x1882   :  { %v1737_v3 = vsel %vm1736_vm1, %v1728_v11, %v1734_v18 }
0x1883   :  { %v1873_v31 = vadd.f32 %v1851_v47, %v1737_v3  ;;  %v1869_v21 = vadd.f32 %v1843_v12, %v1737_v3  ;;  %v1872_v23 = vadd.f32 %v1862_v26, %v1737_v3  ;;  %v1870_v24 = vadd.f32 %v1861_v20, %v1737_v3 }
0x1884   :  { %v1874_v53 = vadd.f32 %v1863_v22, %v1737_v3  ;;  %v1871_v52 = vadd.f32 %v1846_v15, %v1737_v3 }
0x1885   :  { %2321 = vtanh.f32 %v1873_v31 }
0x1886   :  { %2323 = vtanh.f32 %v1869_v21 }
0x1887   :  { %2325 = vtanh.f32 %v1872_v23 }
0x1888   :  { %2327 = vtanh.f32 %v1870_v24 }
0x1889   :  { %2329 = vtanh.f32 %v1874_v53 }
0x188a   :  { %2331 = vtanh.f32 %v1871_v52 }
0x188f   :  { %v2322_v28 = vpop.eup %2321 }
0x1890   :  { %v2324_v29 = vpop.eup %2323  ;;  %v1894_v33 = vmul.f32 %v2322_v28, %v2088_v25 }
0x1891   :  { %v2326_v41 = vpop.eup %2325  ;;  %v1890_v36 = vmul.f32 %v2324_v29, %v2088_v25  ;;  %v2380_v29 = vmov -inf  }
0x1892   :  { %v2328_v37 = vpop.eup %2327  ;;  %v1910_v38 = vsel %vm616_vm5, %v1894_v33, 0.0  ;;  %v1893_v40 = vmul.f32 %v2326_v41, %v2088_v25  ;;  %v2028_v33 = vsel %vm2019_vm2, -1e+30, %v2380_v29 }
0x1893   :  { %v2330_v54 = vpop.eup %2329  ;;  %1911 = vadd.xlane.f32.xlu0 %v1910_v38  ;;  %v1898_v39 = vsel %vm616_vm5, %v1890_v36, 0.0  ;;  %v1891_v42 = vmul.f32 %v2328_v37, %v2088_v25 }
0x1894   :  { %v2332_v43 = vpop.eup %2331  ;;  %1899 = vadd.xlane.f32.xlu1 %v1898_v39  ;;  %v1907_v1 = vsel %vm616_vm5, %v1893_v40, 0.0  ;;  %v1895_v48 = vmul.f32 %v2330_v54, %v2088_v25 }
0x1895   :  { %v1901_v49 = vsel %vm616_vm5, %v1891_v42, 0.0  ;;  %v1892_v50 = vmul.f32 %v2332_v43, %v2088_v25 }
0x1896   :  { %v1913_v59 = vsel %vm616_vm5, %v1895_v48, 0.0 }
0x1897   :  { %1902 = vadd.xlane.f32.xlu0 %v1901_v49  ;;  %v1904_v55 = vsel %vm616_vm5, %v1892_v50, 0.0 }
0x1898   :  { %1908 = vadd.xlane.f32.xlu1 %v1907_v1 }
0x189b   :  { %1905 = vadd.xlane.f32.xlu0 %v1904_v55 }
0x189c   :  { %1914 = vadd.xlane.f32.xlu1 %v1913_v59 }
0x18b1   :  { %1952 = vrot.lane.b32.xlu0 %v2089_v61, %s2379_s1 }
0x1920   :  { %v1912_v14 = vpop.xlane.xlu0 %1911 }
0x1921   :  { %v1900_v62 = vpop.xlane.xlu1 %1899  ;;  %v1931_v17 = vadd.f32 %v2089_v61, %v1912_v14 }
0x1922   :  { %v1927_v57 = vadd.f32 %v2089_v61, %v1900_v62 }
0x1923   :  { %v1943_v8 = vmul.f32 1.442695, %v1931_v17 }
0x1924   :  { %v1935_v0 = vmul.f32 1.442695, %v1927_v57  ;;  %v1903_v27 = vpop.xlane.xlu0 %1902 }
0x1925   :  { %v1909_v2 = vpop.xlane.xlu1 %1908  ;;  %v1928_v4 = vadd.f32 %v2089_v61, %v1903_v27 }
0x1926   :  { %2333 = vpow2.f32 %v1935_v0  ;;  %v1930_v30 = vadd.f32 %v2089_v61, %v1909_v2 }
0x1927   :  { %v1937_v5 = vmul.f32 1.442695, %v1928_v4 }
0x1928   :  { %v1941_v56 = vmul.f32 1.442695, %v1930_v30  ;;  %v1906_v6 = vpop.xlane.xlu0 %1905 }
0x1929   :  { %2335 = vpow2.f32 %v1937_v5  ;;  %v1915_v7 = vpop.xlane.xlu1 %1914  ;;  %v1929_v45 = vadd.f32 %v2089_v61, %v1906_v6 }
0x192a   :  { %v1932_v46 = vadd.f32 %v2089_v61, %v1915_v7  ;;  %2337 = vpow2.f32 %v1941_v56 }
0x192b   :  { %v1939_v9 = vmul.f32 1.442695, %v1929_v45 }
0x192c   :  { %v1945_v10 = vmul.f32 1.442695, %v1932_v46  ;;  %v1953_v12 = vpop.permute.xlu0 %1952 }
0x192d   :  { %2339 = vpow2.f32 %v1939_v9 }
0x192e   :  { %2341 = vpow2.f32 %v1943_v8 }
0x192f   :  { %2343 = vpow2.f32 %v1945_v10 }
0x1930   :  { %v2334_v15 = vpop.eup %2333 }
0x1931   :  { %v1955_v32 = vmul.f32 %v2334_v15, %v1953_v12 }
0x1933   :  { %v2336_v47 = vpop.eup %2335  ;;  %1965 = vperm.xlu1 %2256, %v1955_v32  }
0x1934   :  { %v1956_v11 = vmul.f32 %v2336_v47, %v1953_v12  ;;  %v2338_v16 = vpop.eup %2337 }
0x1935   :  { %v1958_v20 = vmul.f32 %v2338_v16, %v1953_v12 }
0x1937   :  { %v2340_v34 = vpop.eup %2339  ;;  %1970 = vperm.xlu1 %2256, %v1956_v11  }
0x1938   :  { %v1957_v18 = vmul.f32 %v2340_v34, %v1953_v12  ;;  %v2342_v19 = vpop.eup %2341 }
0x1939   :  { %v2344_v26 = vpop.eup %2343  ;;  %v1959_v22 = vmul.f32 %v2342_v19, %v1953_v12 }
0x193a   :  { %1975 = vperm.xlu0 %2255, %v1957_v18   ;;  %v1960_v3 = vmul.f32 %v2344_v26, %v1953_v12 }
0x193b   :  { %1980 = vperm.xlu1 %2256, %v1958_v20  }
0x193e   :  { %1985 = vperm.xlu0 %2255, %v1959_v22  }
0x193f   :  { %1990 = vperm.xlu1 %2256, %v1960_v3  }
0x1942   :  { %1662 = vrot.lane.b32.xlu0 %v2805_v44, %s2378_s27 }
0x19b2   :  { %v1966_v31 = vpop.permute.xlu1 %1965 }
0x19b3   :  { %v2003_v25 = vmul.f32 %v1966_v31, %v2812_v51 }
0x19b6   :  { %v1971_v21 = vpop.permute.xlu1 %1970 }
0x19b7   :  { %v2004_v28 = vmul.f32 %v1971_v21, %v2815_v35 }
0x19b9   :  { %v1976_v23 = vpop.permute.xlu0 %1975  ;;  %v2021_v39 = vsel %vm2019_vm2, %v2004_v28, -inf }
0x19ba   :  { %v2005_v24 = vmul.f32 %v1976_v23, %v2819_v13  ;;  %v1981_v53 = vpop.permute.xlu1 %1980 }
0x19bb   :  { %v2006_v52 = vmul.f32 %v1981_v53, %v2821_v58  ;;  %v2020_v58 = vsel %vm2019_vm2, %v2003_v25, -inf }
0x19bc   :  { %v2022_v41 = vsel %vm2019_vm2, %v2005_v24, -inf }
0x19bd   :  { %v2023_v44 = vsel %vm2019_vm2, %v2006_v52, -inf  ;;  %v1986_v36 = vpop.permute.xlu0 %1985  ;;  %v2029_v54 = vmax.f32 %v2022_v41, %v2028_v33 }
0x19be   :  { %v2007_v37 = vmul.f32 %v1986_v36, %v2830_v60  ;;  %v1991_v38 = vpop.permute.xlu1 %1990  ;;  %v2031_v51 = vmax.f32 %v2023_v44, %v2028_v33 }
0x19bf   :  { %v2008_v13 = vmul.f32 %v1991_v38, %v2832_v63 }
0x19c0   :  { %v2024_v35 = vsel %vm2019_vm2, %v2007_v37, -inf  ;;  %v2033_v60 = vmax.f32 %v2029_v54, %v2031_v51 }
0x19c1   :  { %v2025_v40 = vmax.f32 %v2020_v58, %v2024_v35  ;;  %v2026_v42 = vsel %vm2019_vm2, %v2008_v13, -inf  ;;  %v1663_v43 = vpop.permute.xlu0 %1662 }
0x19c2   :  { %v2027_v49 = vmax.f32 %v2021_v39, %v2026_v42  ;;  %1666 = vst.msk [vmem:[%s2871_s3] sm:$0x3] %vm1665_vm3, %v1663_v43 }
0x19c4   :  { %v2032_v63 = vmax.f32 %v2025_v40, %v2027_v49 }
0x19c6   :  { %v2034_v50 = vmax.f32 %v2032_v63, %v2033_v60 }
0x19c8   :  { %2035 = vst.msk [vmem:[%s2871_s3 + $0x2] sm:$0xf] %vm2019_vm2, %v2034_v50 }
0x19c9   :  { %2040 = vsyncpa [#allocation5], 1 }

</bundles_post_ra>
